<compile_context>
chip_gen: v7x
topology: tpu7x:2x2x1
jax: 0.10.0
libtpu: 0.0.40
codegen_flags: <defaults>
</compile_context>

<pallas_src>
import functools

import jax
import jax.numpy as jnp
from jax import lax
from jax.experimental import pallas as pl
from jax.experimental.pallas import tpu as pltpu


def _triplet_loss_kernel(lab_sref, emb_ref, lab_col_ref, lab_row_ref, out_ref,
                         xn_ref, acc_ref, cnt_ref, *, margin, n, block_a):
    step = pl.program_id(0)

    # ---- one-time init: normalize embeddings (rsqrt on EUP), zero accumulators ----------
    @pl.when(step == 0)
    def _init():
        x = emb_ref[...]                                           # (N, Dp) f32
        ssq = jnp.sum(x * x, axis=1, keepdims=True)                # (N, 1)
        xn_ref[...] = x * lax.rsqrt(jnp.maximum(ssq, 1e-24))       # F.normalize semantics
        acc_ref[...] = jnp.zeros_like(acc_ref)
        cnt_ref[...] = jnp.zeros_like(cnt_ref)

    xn = xn_ref[...]                                               # (N, Dp) normalized
    a0 = pl.multiple_of(step * block_a, block_a)                   # first anchor of block
    xa = xn_ref[pl.ds(a0, block_a), :]                             # (TA, Dp) anchor slab

    # ---- distance slabs for this anchor block via MXU ------------------------------------
    g_rows = lax.dot_general(xa, xn, (((1,), (1,)), ((), ())),
                             preferred_element_type=jnp.float32)   # (TA, N)
    g_cols = lax.dot_general(xn, xa, (((1,), (1,)), ((), ())),
                             preferred_element_type=jnp.float32)   # (N, TA)
    row_slab = jnp.sqrt(jnp.maximum(2.0 - 2.0 * g_rows, 0.0))      # d(a, n): n along lanes
    col_slab = jnp.sqrt(jnp.maximum(2.0 - 2.0 * g_cols, 0.0))      # d(a, p): p along sublanes

    lab_c = lab_col_ref[...]                                       # (N, 1) int32
    lab_r = lab_row_ref[...]                                       # (1, N) int32
    row_i = lax.broadcasted_iota(jnp.int32, (n, 1), 0)             # candidate-positive index

    acc = jnp.zeros((n, n), jnp.float32)                           # vector accumulators
    cnt = jnp.zeros((n, n), jnp.float32)
    # Fully-unrolled anchor loop (block_a is small & static) -> only static slices + VPU math.
    for t in range(block_a):
        a = a0 + t                                                 # global anchor index
        lab_a = lab_sref[a]                                        # scalar label from SMEM
        an_row = row_slab[t:t + 1, :]                              # (1, N)  d(a, n)
        ap_col = col_slab[:, t:t + 1]                              # (N, 1)  d(a, p) (symmetry)
        pos_col = jnp.where((lab_c == lab_a) & (row_i != a), 1.0, 0.0)   # (N, 1) valid p
        neg_row = jnp.where(lab_r != lab_a, 1.0, 0.0)                     # (1, N) valid n
        diff = an_row - ap_col                                     # (N, N): d(a,n) - d(a,p)
        mined = (pos_col * neg_row) * jnp.where((diff > 0.0) & (diff <= margin), 1.0, 0.0)
        acc = acc + mined * (margin - diff)                        # == mined * relu(margin - diff)
        cnt = cnt + mined * jnp.where(diff < margin, 1.0, 0.0)     # l > 0  <=>  diff < margin

    acc_ref[...] += acc
    cnt_ref[...] += cnt

    # ---- finalize: single reduction + AvgNonZeroReducer ----------------------------------
    @pl.when(step == pl.num_programs(0) - 1)
    def _finalize():
        total = jnp.sum(acc_ref[...], keepdims=True)               # (1, 1)
        count = jnp.sum(cnt_ref[...], keepdims=True)               # (1, 1)
        out_ref[...] = jnp.where(count > 0.0, total / jnp.maximum(count, 1.0), 0.0)


def triplet_loss_pallas(embeddings, labels, margin=0.1, block_a=8):
    n, d = embeddings.shape
    dp = ((d + 127) // 128) * 128                 # pad feature dim to full 128-lane vregs / MXU K
    emb = embeddings.astype(jnp.float32)
    if dp != d:
        emb = jnp.pad(emb, ((0, 0), (0, dp - d)))  # zero cols: norms & gram unchanged
    if n % block_a != 0:
        block_a = n                               # fall back to a single anchor block
    labels_i = labels.astype(jnp.int32).reshape(n)
    lab_col = labels_i.reshape(n, 1)
    lab_row = labels_i.reshape(1, n)

    kernel = functools.partial(_triplet_loss_kernel, margin=float(margin), n=n,
                               block_a=block_a)
    out = pl.pallas_call(
        kernel,
        out_shape=jax.ShapeDtypeStruct((1, 1), jnp.float32),
        grid_spec=pltpu.PrefetchScalarGridSpec(
            num_scalar_prefetch=1,                               # labels -> SMEM scalars
            grid=(n // block_a,),                                # anchor blocks
            in_specs=[
                pl.BlockSpec((n, dp), lambda i, lab: (0, 0)),    # embeddings (resident)
                pl.BlockSpec((n, 1), lambda i, lab: (0, 0)),     # labels as column
                pl.BlockSpec((1, n), lambda i, lab: (0, 0)),     # labels as row
            ],
            out_specs=pl.BlockSpec((1, 1), lambda i, lab: (0, 0)),
            scratch_shapes=[
                pltpu.VMEM((n, dp), jnp.float32),                # normalized embeddings
                pltpu.VMEM((n, n), jnp.float32),                 # loss accumulator
                pltpu.VMEM((n, n), jnp.float32),                 # nonzero-count accumulator
            ],
        ),
        compiler_params=pltpu.CompilerParams(dimension_semantics=("arbitrary",)),
    )(labels_i, emb, lab_col, lab_row)
    return out[0, 0]


def triplet_loss_reference(embeddings, labels, margin=0.1):
    """Pure-JAX reference mirroring miner + TripletMarginLoss + AvgNonZeroReducer."""
    x = embeddings / jnp.maximum(jnp.linalg.norm(embeddings, axis=-1, keepdims=True), 1e-12)
    mat = jnp.sqrt(jnp.maximum(2.0 - 2.0 * (x @ x.T), 0.0))
    n = embeddings.shape[0]
    same = labels[:, None] == labels[None, :]
    pos = same & ~jnp.eye(n, dtype=bool)
    neg = ~same
    ap = mat[:, :, None]
    an = mat[:, None, :]
    valid = pos[:, :, None] & neg[:, None, :]
    diff = an - ap
    mined = valid & (diff > 0.0) & (diff <= margin)
    l = jnp.maximum(margin - diff, 0.0)
    total = jnp.sum(jnp.where(mined, l, 0.0))
    cnt = jnp.sum((mined & (l > 0.0)).astype(jnp.float32))
    return jnp.where(cnt > 0.0, total / jnp.maximum(cnt, 1.0), 0.0)


if __name__ == "__main__":
    N, D = 16, 32
    MARGIN = 0.1

    key = jax.random.PRNGKey(0)
    k_emb, k_lab = jax.random.split(key)
    embeddings = jax.random.normal(k_emb, (N, D), dtype=jnp.float32)
    labels = jax.random.randint(k_lab, (N,), 0, 4, dtype=jnp.int32)

    loss = jax.block_until_ready(triplet_loss_pallas(embeddings, labels, margin=MARGIN))
    ref = jax.block_until_ready(triplet_loss_reference(embeddings, labels, margin=MARGIN))
    assert jnp.allclose(loss, ref, atol=2e-5, rtol=2e-5), (loss, ref)

    print("KERNEL_OK")
</pallas_src>

<mosaic_0001>
module attributes {stable_mosaic.version = 11 : i64} {
  func.func @_triplet_loss_kernel(%arg0: i32, %arg1: memref<16xi32, #tpu.memory_space<smem>>, %arg2: memref<16x128xf32, #tpu.memory_space<vmem>>, %arg3: memref<16x1xi32, #tpu.memory_space<vmem>>, %arg4: memref<1x16xi32, #tpu.memory_space<vmem>>, %arg5: memref<1x1xf32, #tpu.memory_space<vmem>>, %arg6: memref<16x128xf32, #tpu.memory_space<vmem>>, %arg7: memref<16x16xf32, #tpu.memory_space<vmem>>, %arg8: memref<16x16xf32, #tpu.memory_space<vmem>>) attributes {dimension_semantics = [#tpu.dimension_semantics<arbitrary>], iteration_bounds = array<i64: 2>, scalar_prefetch = 1 : i64, scratch_operands = 3 : i64, tpu.core_type = #tpu.core_type<tc>, window_params = [{pipeline_mode = #tpu.pipeline_mode<synchronous>, transform_indices = @transform_0, window_bounds = array<i64: 16, 128>}, {pipeline_mode = #tpu.pipeline_mode<synchronous>, transform_indices = @transform_1, window_bounds = array<i64: 16, 1>}, {pipeline_mode = #tpu.pipeline_mode<synchronous>, transform_indices = @transform_2, window_bounds = array<i64: 1, 16>}, {pipeline_mode = #tpu.pipeline_mode<synchronous>, transform_indices = @transform_3, window_bounds = array<i64: 1, 1>}]} {
    %c0_i32 = arith.constant 0 : i32
    %0 = arith.cmpi eq, %arg0, %c0_i32 : i32
    %1 = arith.extui %0 : i1 to i32
    %c0_i32_0 = arith.constant 0 : i32
    %2 = arith.cmpi ne, %1, %c0_i32_0 : i32
    scf.if %2 {
      %c0_123 = arith.constant 0 : index
      %c0_124 = arith.constant 0 : index
      %390 = vector.load %arg2[%c0_123, %c0_124] : memref<16x128xf32, #tpu.memory_space<vmem>>, vector<16x128xf32>
      %391 = arith.mulf %390, %390 : vector<16x128xf32>
      %cst_125 = arith.constant dense<0.000000e+00> : vector<16xf32>
      %392 = vector.multi_reduction <add>, %391, %cst_125 [1] : vector<16x128xf32> to vector<16xf32>
      %393 = vector.shape_cast %392 : vector<16xf32> to vector<16x1xf32>
      %cst_126 = arith.constant 1.000000e-24 : f32
      %394 = vector.broadcast %cst_126 : f32 to vector<16x1xf32>
      %395 = arith.maximumf %393, %394 : vector<16x1xf32>
      %396 = math.rsqrt %395 : vector<16x1xf32>
      %397 = vector.broadcast %396 : vector<16x1xf32> to vector<16x128xf32>
      %398 = arith.mulf %390, %397 : vector<16x128xf32>
      %c0_127 = arith.constant 0 : index
      %c0_128 = arith.constant 0 : index
      %399 = vector.load %arg6[%c0_127, %c0_128] : memref<16x128xf32, #tpu.memory_space<vmem>>, vector<16x128xf32>
      tpu.vector_store %arg6[%c0_127, %c0_128], %398 {strides = array<i32>} : memref<16x128xf32, #tpu.memory_space<vmem>>, vector<16x128xf32>,
      %cst_129 = arith.constant 0.000000e+00 : f32
      %400 = vector.broadcast %cst_129 : f32 to vector<16x16xf32>
      %c0_130 = arith.constant 0 : index
      %c0_131 = arith.constant 0 : index
      %401 = vector.load %arg7[%c0_130, %c0_131] : memref<16x16xf32, #tpu.memory_space<vmem>>, vector<16x16xf32>
      tpu.vector_store %arg7[%c0_130, %c0_131], %400 {strides = array<i32>} : memref<16x16xf32, #tpu.memory_space<vmem>>, vector<16x16xf32>,
      %cst_132 = arith.constant 0.000000e+00 : f32
      %402 = vector.broadcast %cst_132 : f32 to vector<16x16xf32>
      %c0_133 = arith.constant 0 : index
      %c0_134 = arith.constant 0 : index
      %403 = vector.load %arg8[%c0_133, %c0_134] : memref<16x16xf32, #tpu.memory_space<vmem>>, vector<16x16xf32>
      tpu.vector_store %arg8[%c0_133, %c0_134], %402 {strides = array<i32>} : memref<16x16xf32, #tpu.memory_space<vmem>>, vector<16x16xf32>,
    } else {
    }
    %c0 = arith.constant 0 : index
    %c0_1 = arith.constant 0 : index
    %3 = vector.load %arg6[%c0, %c0_1] : memref<16x128xf32, #tpu.memory_space<vmem>>, vector<16x128xf32>
    %c8_i32 = arith.constant 8 : i32
    %4 = arith.muli %arg0, %c8_i32 : i32
    %5 = tpu.assume_multiple %4, 8 : i32
    %6 = arith.index_cast %5 : i32 to index
    %c0_2 = arith.constant 0 : index
    %7 = vector.load %arg6[%6, %c0_2] : memref<16x128xf32, #tpu.memory_space<vmem>>, vector<8x128xf32>
    %cst = arith.constant dense<0.000000e+00> : vector<8x16xf32>
    %8 = tpu.matmul %7, %3, %cst {dimension_numbers = #tpu.dot_dimension_numbers<[1], [1], [0], [0], [0, 0, 1, 0], [], []>} : vector<8x128xf32>, vector<16x128xf32>, vector<8x16xf32> -> vector<8x16xf32>
    %cst_3 = arith.constant dense<0.000000e+00> : vector<16x8xf32>
    %9 = tpu.matmul %3, %7, %cst_3 {dimension_numbers = #tpu.dot_dimension_numbers<[1], [1], [0], [0], [0, 0, 1, 0], [], []>} : vector<16x128xf32>, vector<8x128xf32>, vector<16x8xf32> -> vector<16x8xf32>
    %cst_4 = arith.constant 2.000000e+00 : f32
    %10 = vector.broadcast %cst_4 : f32 to vector<8x16xf32>
    %11 = arith.mulf %10, %8 : vector<8x16xf32>
    %cst_5 = arith.constant 2.000000e+00 : f32
    %12 = vector.broadcast %cst_5 : f32 to vector<8x16xf32>
    %13 = arith.subf %12, %11 : vector<8x16xf32>
    %cst_6 = arith.constant 0.000000e+00 : f32
    %14 = vector.broadcast %cst_6 : f32 to vector<8x16xf32>
    %15 = arith.maximumf %13, %14 : vector<8x16xf32>
    %16 = math.sqrt %15 : vector<8x16xf32>
    %cst_7 = arith.constant 2.000000e+00 : f32
    %17 = vector.broadcast %cst_7 : f32 to vector<16x8xf32>
    %18 = arith.mulf %17, %9 : vector<16x8xf32>
    %cst_8 = arith.constant 2.000000e+00 : f32
    %19 = vector.broadcast %cst_8 : f32 to vector<16x8xf32>
    %20 = arith.subf %19, %18 : vector<16x8xf32>
    %cst_9 = arith.constant 0.000000e+00 : f32
    %21 = vector.broadcast %cst_9 : f32 to vector<16x8xf32>
    %22 = arith.maximumf %20, %21 : vector<16x8xf32>
    %23 = math.sqrt %22 : vector<16x8xf32>
    %c0_10 = arith.constant 0 : index
    %c0_11 = arith.constant 0 : index
    %24 = vector.load %arg3[%c0_10, %c0_11] : memref<16x1xi32, #tpu.memory_space<vmem>>, vector<16x1xi32>
    %c0_12 = arith.constant 0 : index
    %c0_13 = arith.constant 0 : index
    %25 = vector.load %arg4[%c0_12, %c0_13] : memref<1x16xi32, #tpu.memory_space<vmem>>, vector<1x16xi32>
    %26 = tpu.iota {dimensions = array<i32: 0>} : vector<16x1xi32>
    %cst_14 = arith.constant 0.000000e+00 : f32
    %27 = vector.broadcast %cst_14 : f32 to vector<16x16xf32>
    %cst_15 = arith.constant 0.000000e+00 : f32
    %28 = vector.broadcast %cst_15 : f32 to vector<16x16xf32>
    %c0_i32_16 = arith.constant 0 : i32
    %29 = arith.addi %5, %c0_i32_16 : i32
    %30 = arith.index_cast %29 : i32 to index
    %31 = memref.load %arg1[%30] : memref<16xi32, #tpu.memory_space<smem>>
    %32 = vector.extract_strided_slice %16 {offsets = [0, 0], sizes = [1, 16], strides = [1, 1]} : vector<8x16xf32> to vector<1x16xf32>
    %33 = vector.extract_strided_slice %23 {offsets = [0, 0], sizes = [16, 1], strides = [1, 1]} : vector<16x8xf32> to vector<16x1xf32>
    %34 = vector.broadcast %31 : i32 to vector<16x1xi32>
    %35 = arith.cmpi eq, %24, %34 : vector<16x1xi32>
    %36 = vector.broadcast %29 : i32 to vector<16x1xi32>
    %37 = arith.cmpi ne, %26, %36 : vector<16x1xi32>
    %38 = arith.andi %35, %37 : vector<16x1xi1>
    %cst_17 = arith.constant 1.000000e+00 : f32
    %cst_18 = arith.constant 0.000000e+00 : f32
    %39 = vector.broadcast %cst_17 : f32 to vector<16x1xf32>
    %40 = vector.broadcast %cst_18 : f32 to vector<16x1xf32>
    %41 = arith.select %38, %39, %40 : vector<16x1xi1>, vector<16x1xf32>
    %42 = vector.broadcast %31 : i32 to vector<1x16xi32>
    %43 = arith.cmpi ne, %25, %42 : vector<1x16xi32>
    %cst_19 = arith.constant 1.000000e+00 : f32
    %cst_20 = arith.constant 0.000000e+00 : f32
    %44 = vector.broadcast %cst_19 : f32 to vector<1x16xf32>
    %45 = vector.broadcast %cst_20 : f32 to vector<1x16xf32>
    %46 = arith.select %43, %44, %45 : vector<1x16xi1>, vector<1x16xf32>
    %47 = vector.broadcast %32 : vector<1x16xf32> to vector<16x16xf32>
    %48 = vector.broadcast %33 : vector<16x1xf32> to vector<16x16xf32>
    %49 = arith.subf %47, %48 : vector<16x16xf32>
    %50 = vector.broadcast %41 : vector<16x1xf32> to vector<16x16xf32>
    %51 = vector.broadcast %46 : vector<1x16xf32> to vector<16x16xf32>
    %52 = arith.mulf %50, %51 : vector<16x16xf32>
    %cst_21 = arith.constant 0.000000e+00 : f32
    %53 = vector.broadcast %cst_21 : f32 to vector<16x16xf32>
    %54 = arith.cmpf ogt, %49, %53 : vector<16x16xf32>
    %cst_22 = arith.constant 1.000000e-01 : f32
    %55 = vector.broadcast %cst_22 : f32 to vector<16x16xf32>
    %56 = arith.cmpf ole, %49, %55 : vector<16x16xf32>
    %57 = arith.andi %54, %56 : vector<16x16xi1>
    %cst_23 = arith.constant 1.000000e+00 : f32
    %cst_24 = arith.constant 0.000000e+00 : f32
    %58 = vector.broadcast %cst_23 : f32 to vector<16x16xf32>
    %59 = vector.broadcast %cst_24 : f32 to vector<16x16xf32>
    %60 = arith.select %57, %58, %59 : vector<16x16xi1>, vector<16x16xf32>
    %61 = arith.mulf %52, %60 : vector<16x16xf32>
    %cst_25 = arith.constant 1.000000e-01 : f32
    %62 = vector.broadcast %cst_25 : f32 to vector<16x16xf32>
    %63 = arith.subf %62, %49 : vector<16x16xf32>
    %64 = arith.mulf %61, %63 : vector<16x16xf32>
    %65 = arith.addf %27, %64 : vector<16x16xf32>
    %cst_26 = arith.constant 1.000000e-01 : f32
    %66 = vector.broadcast %cst_26 : f32 to vector<16x16xf32>
    %67 = arith.cmpf olt, %49, %66 : vector<16x16xf32>
    %cst_27 = arith.constant 1.000000e+00 : f32
    %cst_28 = arith.constant 0.000000e+00 : f32
    %68 = vector.broadcast %cst_27 : f32 to vector<16x16xf32>
    %69 = vector.broadcast %cst_28 : f32 to vector<16x16xf32>
    %70 = arith.select %67, %68, %69 : vector<16x16xi1>, vector<16x16xf32>
    %71 = arith.mulf %61, %70 : vector<16x16xf32>
    %72 = arith.addf %28, %71 : vector<16x16xf32>
    %c1_i32 = arith.constant 1 : i32
    %73 = arith.addi %5, %c1_i32 : i32
    %74 = arith.index_cast %73 : i32 to index
    %75 = memref.load %arg1[%74] : memref<16xi32, #tpu.memory_space<smem>>
    %76 = vector.extract_strided_slice %16 {offsets = [1, 0], sizes = [1, 16], strides = [1, 1]} : vector<8x16xf32> to vector<1x16xf32>
    %77 = vector.extract_strided_slice %23 {offsets = [0, 1], sizes = [16, 1], strides = [1, 1]} : vector<16x8xf32> to vector<16x1xf32>
    %78 = vector.broadcast %75 : i32 to vector<16x1xi32>
    %79 = arith.cmpi eq, %24, %78 : vector<16x1xi32>
    %80 = vector.broadcast %73 : i32 to vector<16x1xi32>
    %81 = arith.cmpi ne, %26, %80 : vector<16x1xi32>
    %82 = arith.andi %79, %81 : vector<16x1xi1>
    %cst_29 = arith.constant 1.000000e+00 : f32
    %cst_30 = arith.constant 0.000000e+00 : f32
    %83 = vector.broadcast %cst_29 : f32 to vector<16x1xf32>
    %84 = vector.broadcast %cst_30 : f32 to vector<16x1xf32>
    %85 = arith.select %82, %83, %84 : vector<16x1xi1>, vector<16x1xf32>
    %86 = vector.broadcast %75 : i32 to vector<1x16xi32>
    %87 = arith.cmpi ne, %25, %86 : vector<1x16xi32>
    %cst_31 = arith.constant 1.000000e+00 : f32
    %cst_32 = arith.constant 0.000000e+00 : f32
    %88 = vector.broadcast %cst_31 : f32 to vector<1x16xf32>
    %89 = vector.broadcast %cst_32 : f32 to vector<1x16xf32>
    %90 = arith.select %87, %88, %89 : vector<1x16xi1>, vector<1x16xf32>
    %91 = vector.broadcast %76 : vector<1x16xf32> to vector<16x16xf32>
    %92 = vector.broadcast %77 : vector<16x1xf32> to vector<16x16xf32>
    %93 = arith.subf %91, %92 : vector<16x16xf32>
    %94 = vector.broadcast %85 : vector<16x1xf32> to vector<16x16xf32>
    %95 = vector.broadcast %90 : vector<1x16xf32> to vector<16x16xf32>
    %96 = arith.mulf %94, %95 : vector<16x16xf32>
    %cst_33 = arith.constant 0.000000e+00 : f32
    %97 = vector.broadcast %cst_33 : f32 to vector<16x16xf32>
    %98 = arith.cmpf ogt, %93, %97 : vector<16x16xf32>
    %cst_34 = arith.constant 1.000000e-01 : f32
    %99 = vector.broadcast %cst_34 : f32 to vector<16x16xf32>
    %100 = arith.cmpf ole, %93, %99 : vector<16x16xf32>
    %101 = arith.andi %98, %100 : vector<16x16xi1>
    %cst_35 = arith.constant 1.000000e+00 : f32
    %cst_36 = arith.constant 0.000000e+00 : f32
    %102 = vector.broadcast %cst_35 : f32 to vector<16x16xf32>
    %103 = vector.broadcast %cst_36 : f32 to vector<16x16xf32>
    %104 = arith.select %101, %102, %103 : vector<16x16xi1>, vector<16x16xf32>
    %105 = arith.mulf %96, %104 : vector<16x16xf32>
    %cst_37 = arith.constant 1.000000e-01 : f32
    %106 = vector.broadcast %cst_37 : f32 to vector<16x16xf32>
    %107 = arith.subf %106, %93 : vector<16x16xf32>
    %108 = arith.mulf %105, %107 : vector<16x16xf32>
    %109 = arith.addf %65, %108 : vector<16x16xf32>
    %cst_38 = arith.constant 1.000000e-01 : f32
    %110 = vector.broadcast %cst_38 : f32 to vector<16x16xf32>
    %111 = arith.cmpf olt, %93, %110 : vector<16x16xf32>
    %cst_39 = arith.constant 1.000000e+00 : f32
    %cst_40 = arith.constant 0.000000e+00 : f32
    %112 = vector.broadcast %cst_39 : f32 to vector<16x16xf32>
    %113 = vector.broadcast %cst_40 : f32 to vector<16x16xf32>
    %114 = arith.select %111, %112, %113 : vector<16x16xi1>, vector<16x16xf32>
    %115 = arith.mulf %105, %114 : vector<16x16xf32>
    %116 = arith.addf %72, %115 : vector<16x16xf32>
    %c2_i32 = arith.constant 2 : i32
    %117 = arith.addi %5, %c2_i32 : i32
    %118 = arith.index_cast %117 : i32 to index
    %119 = memref.load %arg1[%118] : memref<16xi32, #tpu.memory_space<smem>>
    %120 = vector.extract_strided_slice %16 {offsets = [2, 0], sizes = [1, 16], strides = [1, 1]} : vector<8x16xf32> to vector<1x16xf32>
    %121 = vector.extract_strided_slice %23 {offsets = [0, 2], sizes = [16, 1], strides = [1, 1]} : vector<16x8xf32> to vector<16x1xf32>
    %122 = vector.broadcast %119 : i32 to vector<16x1xi32>
    %123 = arith.cmpi eq, %24, %122 : vector<16x1xi32>
    %124 = vector.broadcast %117 : i32 to vector<16x1xi32>
    %125 = arith.cmpi ne, %26, %124 : vector<16x1xi32>
    %126 = arith.andi %123, %125 : vector<16x1xi1>
    %cst_41 = arith.constant 1.000000e+00 : f32
    %cst_42 = arith.constant 0.000000e+00 : f32
    %127 = vector.broadcast %cst_41 : f32 to vector<16x1xf32>
    %128 = vector.broadcast %cst_42 : f32 to vector<16x1xf32>
    %129 = arith.select %126, %127, %128 : vector<16x1xi1>, vector<16x1xf32>
    %130 = vector.broadcast %119 : i32 to vector<1x16xi32>
    %131 = arith.cmpi ne, %25, %130 : vector<1x16xi32>
    %cst_43 = arith.constant 1.000000e+00 : f32
    %cst_44 = arith.constant 0.000000e+00 : f32
    %132 = vector.broadcast %cst_43 : f32 to vector<1x16xf32>
    %133 = vector.broadcast %cst_44 : f32 to vector<1x16xf32>
    %134 = arith.select %131, %132, %133 : vector<1x16xi1>, vector<1x16xf32>
    %135 = vector.broadcast %120 : vector<1x16xf32> to vector<16x16xf32>
    %136 = vector.broadcast %121 : vector<16x1xf32> to vector<16x16xf32>
    %137 = arith.subf %135, %136 : vector<16x16xf32>
    %138 = vector.broadcast %129 : vector<16x1xf32> to vector<16x16xf32>
    %139 = vector.broadcast %134 : vector<1x16xf32> to vector<16x16xf32>
    %140 = arith.mulf %138, %139 : vector<16x16xf32>
    %cst_45 = arith.constant 0.000000e+00 : f32
    %141 = vector.broadcast %cst_45 : f32 to vector<16x16xf32>
    %142 = arith.cmpf ogt, %137, %141 : vector<16x16xf32>
    %cst_46 = arith.constant 1.000000e-01 : f32
    %143 = vector.broadcast %cst_46 : f32 to vector<16x16xf32>
    %144 = arith.cmpf ole, %137, %143 : vector<16x16xf32>
    %145 = arith.andi %142, %144 : vector<16x16xi1>
    %cst_47 = arith.constant 1.000000e+00 : f32
    %cst_48 = arith.constant 0.000000e+00 : f32
    %146 = vector.broadcast %cst_47 : f32 to vector<16x16xf32>
    %147 = vector.broadcast %cst_48 : f32 to vector<16x16xf32>
    %148 = arith.select %145, %146, %147 : vector<16x16xi1>, vector<16x16xf32>
    %149 = arith.mulf %140, %148 : vector<16x16xf32>
    %cst_49 = arith.constant 1.000000e-01 : f32
    %150 = vector.broadcast %cst_49 : f32 to vector<16x16xf32>
    %151 = arith.subf %150, %137 : vector<16x16xf32>
    %152 = arith.mulf %149, %151 : vector<16x16xf32>
    %153 = arith.addf %109, %152 : vector<16x16xf32>
    %cst_50 = arith.constant 1.000000e-01 : f32
    %154 = vector.broadcast %cst_50 : f32 to vector<16x16xf32>
    %155 = arith.cmpf olt, %137, %154 : vector<16x16xf32>
    %cst_51 = arith.constant 1.000000e+00 : f32
    %cst_52 = arith.constant 0.000000e+00 : f32
    %156 = vector.broadcast %cst_51 : f32 to vector<16x16xf32>
    %157 = vector.broadcast %cst_52 : f32 to vector<16x16xf32>
    %158 = arith.select %155, %156, %157 : vector<16x16xi1>, vector<16x16xf32>
    %159 = arith.mulf %149, %158 : vector<16x16xf32>
    %160 = arith.addf %116, %159 : vector<16x16xf32>
    %c3_i32 = arith.constant 3 : i32
    %161 = arith.addi %5, %c3_i32 : i32
    %162 = arith.index_cast %161 : i32 to index
    %163 = memref.load %arg1[%162] : memref<16xi32, #tpu.memory_space<smem>>
    %164 = vector.extract_strided_slice %16 {offsets = [3, 0], sizes = [1, 16], strides = [1, 1]} : vector<8x16xf32> to vector<1x16xf32>
    %165 = vector.extract_strided_slice %23 {offsets = [0, 3], sizes = [16, 1], strides = [1, 1]} : vector<16x8xf32> to vector<16x1xf32>
    %166 = vector.broadcast %163 : i32 to vector<16x1xi32>
    %167 = arith.cmpi eq, %24, %166 : vector<16x1xi32>
    %168 = vector.broadcast %161 : i32 to vector<16x1xi32>
    %169 = arith.cmpi ne, %26, %168 : vector<16x1xi32>
    %170 = arith.andi %167, %169 : vector<16x1xi1>
    %cst_53 = arith.constant 1.000000e+00 : f32
    %cst_54 = arith.constant 0.000000e+00 : f32
    %171 = vector.broadcast %cst_53 : f32 to vector<16x1xf32>
    %172 = vector.broadcast %cst_54 : f32 to vector<16x1xf32>
    %173 = arith.select %170, %171, %172 : vector<16x1xi1>, vector<16x1xf32>
    %174 = vector.broadcast %163 : i32 to vector<1x16xi32>
    %175 = arith.cmpi ne, %25, %174 : vector<1x16xi32>
    %cst_55 = arith.constant 1.000000e+00 : f32
    %cst_56 = arith.constant 0.000000e+00 : f32
    %176 = vector.broadcast %cst_55 : f32 to vector<1x16xf32>
    %177 = vector.broadcast %cst_56 : f32 to vector<1x16xf32>
    %178 = arith.select %175, %176, %177 : vector<1x16xi1>, vector<1x16xf32>
    %179 = vector.broadcast %164 : vector<1x16xf32> to vector<16x16xf32>
    %180 = vector.broadcast %165 : vector<16x1xf32> to vector<16x16xf32>
    %181 = arith.subf %179, %180 : vector<16x16xf32>
    %182 = vector.broadcast %173 : vector<16x1xf32> to vector<16x16xf32>
    %183 = vector.broadcast %178 : vector<1x16xf32> to vector<16x16xf32>
    %184 = arith.mulf %182, %183 : vector<16x16xf32>
    %cst_57 = arith.constant 0.000000e+00 : f32
    %185 = vector.broadcast %cst_57 : f32 to vector<16x16xf32>
    %186 = arith.cmpf ogt, %181, %185 : vector<16x16xf32>
    %cst_58 = arith.constant 1.000000e-01 : f32
    %187 = vector.broadcast %cst_58 : f32 to vector<16x16xf32>
    %188 = arith.cmpf ole, %181, %187 : vector<16x16xf32>
    %189 = arith.andi %186, %188 : vector<16x16xi1>
    %cst_59 = arith.constant 1.000000e+00 : f32
    %cst_60 = arith.constant 0.000000e+00 : f32
    %190 = vector.broadcast %cst_59 : f32 to vector<16x16xf32>
    %191 = vector.broadcast %cst_60 : f32 to vector<16x16xf32>
    %192 = arith.select %189, %190, %191 : vector<16x16xi1>, vector<16x16xf32>
    %193 = arith.mulf %184, %192 : vector<16x16xf32>
    %cst_61 = arith.constant 1.000000e-01 : f32
    %194 = vector.broadcast %cst_61 : f32 to vector<16x16xf32>
    %195 = arith.subf %194, %181 : vector<16x16xf32>
    %196 = arith.mulf %193, %195 : vector<16x16xf32>
    %197 = arith.addf %153, %196 : vector<16x16xf32>
    %cst_62 = arith.constant 1.000000e-01 : f32
    %198 = vector.broadcast %cst_62 : f32 to vector<16x16xf32>
    %199 = arith.cmpf olt, %181, %198 : vector<16x16xf32>
    %cst_63 = arith.constant 1.000000e+00 : f32
    %cst_64 = arith.constant 0.000000e+00 : f32
    %200 = vector.broadcast %cst_63 : f32 to vector<16x16xf32>
    %201 = vector.broadcast %cst_64 : f32 to vector<16x16xf32>
    %202 = arith.select %199, %200, %201 : vector<16x16xi1>, vector<16x16xf32>
    %203 = arith.mulf %193, %202 : vector<16x16xf32>
    %204 = arith.addf %160, %203 : vector<16x16xf32>
    %c4_i32 = arith.constant 4 : i32
    %205 = arith.addi %5, %c4_i32 : i32
    %206 = arith.index_cast %205 : i32 to index
    %207 = memref.load %arg1[%206] : memref<16xi32, #tpu.memory_space<smem>>
    %208 = vector.extract_strided_slice %16 {offsets = [4, 0], sizes = [1, 16], strides = [1, 1]} : vector<8x16xf32> to vector<1x16xf32>
    %209 = vector.extract_strided_slice %23 {offsets = [0, 4], sizes = [16, 1], strides = [1, 1]} : vector<16x8xf32> to vector<16x1xf32>
    %210 = vector.broadcast %207 : i32 to vector<16x1xi32>
    %211 = arith.cmpi eq, %24, %210 : vector<16x1xi32>
    %212 = vector.broadcast %205 : i32 to vector<16x1xi32>
    %213 = arith.cmpi ne, %26, %212 : vector<16x1xi32>
    %214 = arith.andi %211, %213 : vector<16x1xi1>
    %cst_65 = arith.constant 1.000000e+00 : f32
    %cst_66 = arith.constant 0.000000e+00 : f32
    %215 = vector.broadcast %cst_65 : f32 to vector<16x1xf32>
    %216 = vector.broadcast %cst_66 : f32 to vector<16x1xf32>
    %217 = arith.select %214, %215, %216 : vector<16x1xi1>, vector<16x1xf32>
    %218 = vector.broadcast %207 : i32 to vector<1x16xi32>
    %219 = arith.cmpi ne, %25, %218 : vector<1x16xi32>
    %cst_67 = arith.constant 1.000000e+00 : f32
    %cst_68 = arith.constant 0.000000e+00 : f32
    %220 = vector.broadcast %cst_67 : f32 to vector<1x16xf32>
    %221 = vector.broadcast %cst_68 : f32 to vector<1x16xf32>
    %222 = arith.select %219, %220, %221 : vector<1x16xi1>, vector<1x16xf32>
    %223 = vector.broadcast %208 : vector<1x16xf32> to vector<16x16xf32>
    %224 = vector.broadcast %209 : vector<16x1xf32> to vector<16x16xf32>
    %225 = arith.subf %223, %224 : vector<16x16xf32>
    %226 = vector.broadcast %217 : vector<16x1xf32> to vector<16x16xf32>
    %227 = vector.broadcast %222 : vector<1x16xf32> to vector<16x16xf32>
    %228 = arith.mulf %226, %227 : vector<16x16xf32>
    %cst_69 = arith.constant 0.000000e+00 : f32
    %229 = vector.broadcast %cst_69 : f32 to vector<16x16xf32>
    %230 = arith.cmpf ogt, %225, %229 : vector<16x16xf32>
    %cst_70 = arith.constant 1.000000e-01 : f32
    %231 = vector.broadcast %cst_70 : f32 to vector<16x16xf32>
    %232 = arith.cmpf ole, %225, %231 : vector<16x16xf32>
    %233 = arith.andi %230, %232 : vector<16x16xi1>
    %cst_71 = arith.constant 1.000000e+00 : f32
    %cst_72 = arith.constant 0.000000e+00 : f32
    %234 = vector.broadcast %cst_71 : f32 to vector<16x16xf32>
    %235 = vector.broadcast %cst_72 : f32 to vector<16x16xf32>
    %236 = arith.select %233, %234, %235 : vector<16x16xi1>, vector<16x16xf32>
    %237 = arith.mulf %228, %236 : vector<16x16xf32>
    %cst_73 = arith.constant 1.000000e-01 : f32
    %238 = vector.broadcast %cst_73 : f32 to vector<16x16xf32>
    %239 = arith.subf %238, %225 : vector<16x16xf32>
    %240 = arith.mulf %237, %239 : vector<16x16xf32>
    %241 = arith.addf %197, %240 : vector<16x16xf32>
    %cst_74 = arith.constant 1.000000e-01 : f32
    %242 = vector.broadcast %cst_74 : f32 to vector<16x16xf32>
    %243 = arith.cmpf olt, %225, %242 : vector<16x16xf32>
    %cst_75 = arith.constant 1.000000e+00 : f32
    %cst_76 = arith.constant 0.000000e+00 : f32
    %244 = vector.broadcast %cst_75 : f32 to vector<16x16xf32>
    %245 = vector.broadcast %cst_76 : f32 to vector<16x16xf32>
    %246 = arith.select %243, %244, %245 : vector<16x16xi1>, vector<16x16xf32>
    %247 = arith.mulf %237, %246 : vector<16x16xf32>
    %248 = arith.addf %204, %247 : vector<16x16xf32>
    %c5_i32 = arith.constant 5 : i32
    %249 = arith.addi %5, %c5_i32 : i32
    %250 = arith.index_cast %249 : i32 to index
    %251 = memref.load %arg1[%250] : memref<16xi32, #tpu.memory_space<smem>>
    %252 = vector.extract_strided_slice %16 {offsets = [5, 0], sizes = [1, 16], strides = [1, 1]} : vector<8x16xf32> to vector<1x16xf32>
    %253 = vector.extract_strided_slice %23 {offsets = [0, 5], sizes = [16, 1], strides = [1, 1]} : vector<16x8xf32> to vector<16x1xf32>
    %254 = vector.broadcast %251 : i32 to vector<16x1xi32>
    %255 = arith.cmpi eq, %24, %254 : vector<16x1xi32>
    %256 = vector.broadcast %249 : i32 to vector<16x1xi32>
    %257 = arith.cmpi ne, %26, %256 : vector<16x1xi32>
    %258 = arith.andi %255, %257 : vector<16x1xi1>
    %cst_77 = arith.constant 1.000000e+00 : f32
    %cst_78 = arith.constant 0.000000e+00 : f32
    %259 = vector.broadcast %cst_77 : f32 to vector<16x1xf32>
    %260 = vector.broadcast %cst_78 : f32 to vector<16x1xf32>
    %261 = arith.select %258, %259, %260 : vector<16x1xi1>, vector<16x1xf32>
    %262 = vector.broadcast %251 : i32 to vector<1x16xi32>
    %263 = arith.cmpi ne, %25, %262 : vector<1x16xi32>
    %cst_79 = arith.constant 1.000000e+00 : f32
    %cst_80 = arith.constant 0.000000e+00 : f32
    %264 = vector.broadcast %cst_79 : f32 to vector<1x16xf32>
    %265 = vector.broadcast %cst_80 : f32 to vector<1x16xf32>
    %266 = arith.select %263, %264, %265 : vector<1x16xi1>, vector<1x16xf32>
    %267 = vector.broadcast %252 : vector<1x16xf32> to vector<16x16xf32>
    %268 = vector.broadcast %253 : vector<16x1xf32> to vector<16x16xf32>
    %269 = arith.subf %267, %268 : vector<16x16xf32>
    %270 = vector.broadcast %261 : vector<16x1xf32> to vector<16x16xf32>
    %271 = vector.broadcast %266 : vector<1x16xf32> to vector<16x16xf32>
    %272 = arith.mulf %270, %271 : vector<16x16xf32>
    %cst_81 = arith.constant 0.000000e+00 : f32
    %273 = vector.broadcast %cst_81 : f32 to vector<16x16xf32>
    %274 = arith.cmpf ogt, %269, %273 : vector<16x16xf32>
    %cst_82 = arith.constant 1.000000e-01 : f32
    %275 = vector.broadcast %cst_82 : f32 to vector<16x16xf32>
    %276 = arith.cmpf ole, %269, %275 : vector<16x16xf32>
    %277 = arith.andi %274, %276 : vector<16x16xi1>
    %cst_83 = arith.constant 1.000000e+00 : f32
    %cst_84 = arith.constant 0.000000e+00 : f32
    %278 = vector.broadcast %cst_83 : f32 to vector<16x16xf32>
    %279 = vector.broadcast %cst_84 : f32 to vector<16x16xf32>
    %280 = arith.select %277, %278, %279 : vector<16x16xi1>, vector<16x16xf32>
    %281 = arith.mulf %272, %280 : vector<16x16xf32>
    %cst_85 = arith.constant 1.000000e-01 : f32
    %282 = vector.broadcast %cst_85 : f32 to vector<16x16xf32>
    %283 = arith.subf %282, %269 : vector<16x16xf32>
    %284 = arith.mulf %281, %283 : vector<16x16xf32>
    %285 = arith.addf %241, %284 : vector<16x16xf32>
    %cst_86 = arith.constant 1.000000e-01 : f32
    %286 = vector.broadcast %cst_86 : f32 to vector<16x16xf32>
    %287 = arith.cmpf olt, %269, %286 : vector<16x16xf32>
    %cst_87 = arith.constant 1.000000e+00 : f32
    %cst_88 = arith.constant 0.000000e+00 : f32
    %288 = vector.broadcast %cst_87 : f32 to vector<16x16xf32>
    %289 = vector.broadcast %cst_88 : f32 to vector<16x16xf32>
    %290 = arith.select %287, %288, %289 : vector<16x16xi1>, vector<16x16xf32>
    %291 = arith.mulf %281, %290 : vector<16x16xf32>
    %292 = arith.addf %248, %291 : vector<16x16xf32>
    %c6_i32 = arith.constant 6 : i32
    %293 = arith.addi %5, %c6_i32 : i32
    %294 = arith.index_cast %293 : i32 to index
    %295 = memref.load %arg1[%294] : memref<16xi32, #tpu.memory_space<smem>>
    %296 = vector.extract_strided_slice %16 {offsets = [6, 0], sizes = [1, 16], strides = [1, 1]} : vector<8x16xf32> to vector<1x16xf32>
    %297 = vector.extract_strided_slice %23 {offsets = [0, 6], sizes = [16, 1], strides = [1, 1]} : vector<16x8xf32> to vector<16x1xf32>
    %298 = vector.broadcast %295 : i32 to vector<16x1xi32>
    %299 = arith.cmpi eq, %24, %298 : vector<16x1xi32>
    %300 = vector.broadcast %293 : i32 to vector<16x1xi32>
    %301 = arith.cmpi ne, %26, %300 : vector<16x1xi32>
    %302 = arith.andi %299, %301 : vector<16x1xi1>
    %cst_89 = arith.constant 1.000000e+00 : f32
    %cst_90 = arith.constant 0.000000e+00 : f32
    %303 = vector.broadcast %cst_89 : f32 to vector<16x1xf32>
    %304 = vector.broadcast %cst_90 : f32 to vector<16x1xf32>
    %305 = arith.select %302, %303, %304 : vector<16x1xi1>, vector<16x1xf32>
    %306 = vector.broadcast %295 : i32 to vector<1x16xi32>
    %307 = arith.cmpi ne, %25, %306 : vector<1x16xi32>
    %cst_91 = arith.constant 1.000000e+00 : f32
    %cst_92 = arith.constant 0.000000e+00 : f32
    %308 = vector.broadcast %cst_91 : f32 to vector<1x16xf32>
    %309 = vector.broadcast %cst_92 : f32 to vector<1x16xf32>
    %310 = arith.select %307, %308, %309 : vector<1x16xi1>, vector<1x16xf32>
    %311 = vector.broadcast %296 : vector<1x16xf32> to vector<16x16xf32>
    %312 = vector.broadcast %297 : vector<16x1xf32> to vector<16x16xf32>
    %313 = arith.subf %311, %312 : vector<16x16xf32>
    %314 = vector.broadcast %305 : vector<16x1xf32> to vector<16x16xf32>
    %315 = vector.broadcast %310 : vector<1x16xf32> to vector<16x16xf32>
    %316 = arith.mulf %314, %315 : vector<16x16xf32>
    %cst_93 = arith.constant 0.000000e+00 : f32
    %317 = vector.broadcast %cst_93 : f32 to vector<16x16xf32>
    %318 = arith.cmpf ogt, %313, %317 : vector<16x16xf32>
    %cst_94 = arith.constant 1.000000e-01 : f32
    %319 = vector.broadcast %cst_94 : f32 to vector<16x16xf32>
    %320 = arith.cmpf ole, %313, %319 : vector<16x16xf32>
    %321 = arith.andi %318, %320 : vector<16x16xi1>
    %cst_95 = arith.constant 1.000000e+00 : f32
    %cst_96 = arith.constant 0.000000e+00 : f32
    %322 = vector.broadcast %cst_95 : f32 to vector<16x16xf32>
    %323 = vector.broadcast %cst_96 : f32 to vector<16x16xf32>
    %324 = arith.select %321, %322, %323 : vector<16x16xi1>, vector<16x16xf32>
    %325 = arith.mulf %316, %324 : vector<16x16xf32>
    %cst_97 = arith.constant 1.000000e-01 : f32
    %326 = vector.broadcast %cst_97 : f32 to vector<16x16xf32>
    %327 = arith.subf %326, %313 : vector<16x16xf32>
    %328 = arith.mulf %325, %327 : vector<16x16xf32>
    %329 = arith.addf %285, %328 : vector<16x16xf32>
    %cst_98 = arith.constant 1.000000e-01 : f32
    %330 = vector.broadcast %cst_98 : f32 to vector<16x16xf32>
    %331 = arith.cmpf olt, %313, %330 : vector<16x16xf32>
    %cst_99 = arith.constant 1.000000e+00 : f32
    %cst_100 = arith.constant 0.000000e+00 : f32
    %332 = vector.broadcast %cst_99 : f32 to vector<16x16xf32>
    %333 = vector.broadcast %cst_100 : f32 to vector<16x16xf32>
    %334 = arith.select %331, %332, %333 : vector<16x16xi1>, vector<16x16xf32>
    %335 = arith.mulf %325, %334 : vector<16x16xf32>
    %336 = arith.addf %292, %335 : vector<16x16xf32>
    %c7_i32 = arith.constant 7 : i32
    %337 = arith.addi %5, %c7_i32 : i32
    %338 = arith.index_cast %337 : i32 to index
    %339 = memref.load %arg1[%338] : memref<16xi32, #tpu.memory_space<smem>>
    %340 = vector.extract_strided_slice %16 {offsets = [7, 0], sizes = [1, 16], strides = [1, 1]} : vector<8x16xf32> to vector<1x16xf32>
    %341 = vector.extract_strided_slice %23 {offsets = [0, 7], sizes = [16, 1], strides = [1, 1]} : vector<16x8xf32> to vector<16x1xf32>
    %342 = vector.broadcast %339 : i32 to vector<16x1xi32>
    %343 = arith.cmpi eq, %24, %342 : vector<16x1xi32>
    %344 = vector.broadcast %337 : i32 to vector<16x1xi32>
    %345 = arith.cmpi ne, %26, %344 : vector<16x1xi32>
    %346 = arith.andi %343, %345 : vector<16x1xi1>
    %cst_101 = arith.constant 1.000000e+00 : f32
    %cst_102 = arith.constant 0.000000e+00 : f32
    %347 = vector.broadcast %cst_101 : f32 to vector<16x1xf32>
    %348 = vector.broadcast %cst_102 : f32 to vector<16x1xf32>
    %349 = arith.select %346, %347, %348 : vector<16x1xi1>, vector<16x1xf32>
    %350 = vector.broadcast %339 : i32 to vector<1x16xi32>
    %351 = arith.cmpi ne, %25, %350 : vector<1x16xi32>
    %cst_103 = arith.constant 1.000000e+00 : f32
    %cst_104 = arith.constant 0.000000e+00 : f32
    %352 = vector.broadcast %cst_103 : f32 to vector<1x16xf32>
    %353 = vector.broadcast %cst_104 : f32 to vector<1x16xf32>
    %354 = arith.select %351, %352, %353 : vector<1x16xi1>, vector<1x16xf32>
    %355 = vector.broadcast %340 : vector<1x16xf32> to vector<16x16xf32>
    %356 = vector.broadcast %341 : vector<16x1xf32> to vector<16x16xf32>
    %357 = arith.subf %355, %356 : vector<16x16xf32>
    %358 = vector.broadcast %349 : vector<16x1xf32> to vector<16x16xf32>
    %359 = vector.broadcast %354 : vector<1x16xf32> to vector<16x16xf32>
    %360 = arith.mulf %358, %359 : vector<16x16xf32>
    %cst_105 = arith.constant 0.000000e+00 : f32
    %361 = vector.broadcast %cst_105 : f32 to vector<16x16xf32>
    %362 = arith.cmpf ogt, %357, %361 : vector<16x16xf32>
    %cst_106 = arith.constant 1.000000e-01 : f32
    %363 = vector.broadcast %cst_106 : f32 to vector<16x16xf32>
    %364 = arith.cmpf ole, %357, %363 : vector<16x16xf32>
    %365 = arith.andi %362, %364 : vector<16x16xi1>
    %cst_107 = arith.constant 1.000000e+00 : f32
    %cst_108 = arith.constant 0.000000e+00 : f32
    %366 = vector.broadcast %cst_107 : f32 to vector<16x16xf32>
    %367 = vector.broadcast %cst_108 : f32 to vector<16x16xf32>
    %368 = arith.select %365, %366, %367 : vector<16x16xi1>, vector<16x16xf32>
    %369 = arith.mulf %360, %368 : vector<16x16xf32>
    %cst_109 = arith.constant 1.000000e-01 : f32
    %370 = vector.broadcast %cst_109 : f32 to vector<16x16xf32>
    %371 = arith.subf %370, %357 : vector<16x16xf32>
    %372 = arith.mulf %369, %371 : vector<16x16xf32>
    %373 = arith.addf %329, %372 : vector<16x16xf32>
    %cst_110 = arith.constant 1.000000e-01 : f32
    %374 = vector.broadcast %cst_110 : f32 to vector<16x16xf32>
    %375 = arith.cmpf olt, %357, %374 : vector<16x16xf32>
    %cst_111 = arith.constant 1.000000e+00 : f32
    %cst_112 = arith.constant 0.000000e+00 : f32
    %376 = vector.broadcast %cst_111 : f32 to vector<16x16xf32>
    %377 = vector.broadcast %cst_112 : f32 to vector<16x16xf32>
    %378 = arith.select %375, %376, %377 : vector<16x16xi1>, vector<16x16xf32>
    %379 = arith.mulf %369, %378 : vector<16x16xf32>
    %380 = arith.addf %336, %379 : vector<16x16xf32>
    %c0_113 = arith.constant 0 : index
    %c0_114 = arith.constant 0 : index
    %381 = vector.load %arg7[%c0_113, %c0_114] : memref<16x16xf32, #tpu.memory_space<vmem>>, vector<16x16xf32>
    %382 = arith.addf %381, %373 : vector<16x16xf32>
    %c0_115 = arith.constant 0 : index
    %c0_116 = arith.constant 0 : index
    %383 = vector.load %arg7[%c0_115, %c0_116] : memref<16x16xf32, #tpu.memory_space<vmem>>, vector<16x16xf32>
    tpu.vector_store %arg7[%c0_115, %c0_116], %382 {strides = array<i32>} : memref<16x16xf32, #tpu.memory_space<vmem>>, vector<16x16xf32>,
    %c0_117 = arith.constant 0 : index
    %c0_118 = arith.constant 0 : index
    %384 = vector.load %arg8[%c0_117, %c0_118] : memref<16x16xf32, #tpu.memory_space<vmem>>, vector<16x16xf32>
    %385 = arith.addf %384, %380 : vector<16x16xf32>
    %c0_119 = arith.constant 0 : index
    %c0_120 = arith.constant 0 : index
    %386 = vector.load %arg8[%c0_119, %c0_120] : memref<16x16xf32, #tpu.memory_space<vmem>>, vector<16x16xf32>
    tpu.vector_store %arg8[%c0_119, %c0_120], %385 {strides = array<i32>} : memref<16x16xf32, #tpu.memory_space<vmem>>, vector<16x16xf32>,
    %c1_i32_121 = arith.constant 1 : i32
    %387 = arith.cmpi eq, %arg0, %c1_i32_121 : i32
    %388 = arith.extui %387 : i1 to i32
    %c0_i32_122 = arith.constant 0 : i32
    %389 = arith.cmpi ne, %388, %c0_i32_122 : i32
    scf.if %389 {
      %c0_123 = arith.constant 0 : index
      %c0_124 = arith.constant 0 : index
      %390 = vector.load %arg7[%c0_123, %c0_124] : memref<16x16xf32, #tpu.memory_space<vmem>>, vector<16x16xf32>
      %391 = vector.shape_cast %390 : vector<16x16xf32> to vector<1x16x16xf32>
      %cst_125 = arith.constant dense<0.000000e+00> : vector<1xf32>
      %392 = vector.multi_reduction <add>, %391, %cst_125 [1, 2] : vector<1x16x16xf32> to vector<1xf32>
      %393 = vector.shape_cast %392 : vector<1xf32> to vector<1x1x1xf32>
      %394 = vector.extract %393[0, 0, 0] : f32 from vector<1x1x1xf32>
      %395 = vector.broadcast %394 : f32 to vector<1x1xf32>
      %c0_126 = arith.constant 0 : index
      %c0_127 = arith.constant 0 : index
      %396 = vector.load %arg8[%c0_126, %c0_127] : memref<16x16xf32, #tpu.memory_space<vmem>>, vector<16x16xf32>
      %397 = vector.shape_cast %396 : vector<16x16xf32> to vector<1x16x16xf32>
      %cst_128 = arith.constant dense<0.000000e+00> : vector<1xf32>
      %398 = vector.multi_reduction <add>, %397, %cst_128 [1, 2] : vector<1x16x16xf32> to vector<1xf32>
      %399 = vector.shape_cast %398 : vector<1xf32> to vector<1x1x1xf32>
      %400 = vector.extract %399[0, 0, 0] : f32 from vector<1x1x1xf32>
      %401 = vector.broadcast %400 : f32 to vector<1x1xf32>
      %cst_129 = arith.constant 0.000000e+00 : f32
      %402 = vector.broadcast %cst_129 : f32 to vector<1x1xf32>
      %403 = arith.cmpf ogt, %401, %402 : vector<1x1xf32>
      %cst_130 = arith.constant 1.000000e+00 : f32
      %404 = vector.broadcast %cst_130 : f32 to vector<1x1xf32>
      %405 = arith.maximumf %401, %404 : vector<1x1xf32>
      %406 = arith.divf %395, %405 : vector<1x1xf32>
      %cst_131 = arith.constant 0.000000e+00 : f32
      %407 = vector.broadcast %cst_131 : f32 to vector<1x1xf32>
      %408 = arith.select %403, %406, %407 : vector<1x1xi1>, vector<1x1xf32>
      %c0_132 = arith.constant 0 : index
      %c0_133 = arith.constant 0 : index
      %409 = vector.load %arg5[%c0_132, %c0_133] : memref<1x1xf32, #tpu.memory_space<vmem>>, vector<1x1xf32>
      tpu.vector_store %arg5[%c0_132, %c0_133], %408 {strides = array<i32>} : memref<1x1xf32, #tpu.memory_space<vmem>>, vector<1x1xf32>,
    } else {
    }
    return
  }
  func.func @transform_0(%arg0: i32, %arg1: memref<16xi32, #tpu.memory_space<smem>>) -> (i32, i32) {
    %c0_i32 = arith.constant 0 : i32
    %c0_i32_0 = arith.constant 0 : i32
    %c0_i32_1 = arith.constant 0 : i32
    return %c0_i32, %c0_i32_0 : i32, i32
  }
  func.func @transform_1(%arg0: i32, %arg1: memref<16xi32, #tpu.memory_space<smem>>) -> (i32, i32) {
    %c0_i32 = arith.constant 0 : i32
    %c0_i32_0 = arith.constant 0 : i32
    %c0_i32_1 = arith.constant 0 : i32
    return %c0_i32, %c0_i32_0 : i32, i32
  }
  func.func @transform_2(%arg0: i32, %arg1: memref<16xi32, #tpu.memory_space<smem>>) -> (i32, i32) {
    %c0_i32 = arith.constant 0 : i32
    %c0_i32_0 = arith.constant 0 : i32
    %c0_i32_1 = arith.constant 0 : i32
    return %c0_i32, %c0_i32_0 : i32, i32
  }
  func.func @transform_3(%arg0: i32, %arg1: memref<16xi32, #tpu.memory_space<smem>>) -> (i32, i32) {
    %c0_i32 = arith.constant 0 : i32
    %c0_i32_0 = arith.constant 0 : i32
    %c0_i32_1 = arith.constant 0 : i32
    return %c0_i32, %c0_i32_0 : i32, i32
  }
}

</mosaic_0001>

<bundles_post_ra>
// kernel: tpu_custom_call.1
= control target key start
LH: loop header
LB: loop body
LE: loop exit
PB: predicated region body
PF: predicated region fallthrough
CT: control target
= control target key end

     0   :  { %s1697_s0 = inlined_call_operand.vmem [shape: s32[16], index: 0, kind: input, shape index: {}]   ;;  %s1698_s1 = inlined_call_operand.vmem [shape: f32[16,128], index: 1, kind: input, shape index: {}]   ;;  %s1699_s2 = inlined_call_operand.vmem [shape: s32[16,1], index: 2, kind: input, shape index: {}]   ;;  %s1700_s3 = inlined_call_operand.vmem [shape: s32[1,16], index: 3, kind: input, shape index: {}]   ;;  %s1701_s4 = inlined_call_operand.hbm [shape: f32[1,1], index: 4, kind: output, shape index: {}]  }
   0x1   :  { %s9_s17 = sshll.u32 %s1697_s0, 4  ;;  %s10_s17 = int_to_ptr.vmem [resolvable:$true] %s9_s17 }
   0x2   :  { %s1141_s18 = scalar_lea.vmem %s10_s17, 16  ;;  %p1146_p1 = scmp.lt.s32.totalorder %s10_s17, %s10_s17 }
   0x3   :  { %p1142_p0 = scmp.ne.s32.totalorder %s10_s17, %s1141_s18  ;;  %p1147_p2 = scmp.lt.s32.totalorder %s1141_s18, %s1141_s18 }
   0x5   :  { %p1148_p3 = por %p1147_p2, %p1146_p1 }
   0x7   :  { %p1149_p4 = pnand %p1148_p3, %p1142_p0 }
   0x9   :  { %1152 = shalt.err (!%p1149_p4)  }
   0xa   :  { %s1193_s19 = smov [#allocation6]  }
   0xb   :  { %12 = dma.vmem_to_smem %s10_s17, 16, %s1193_s19, [#allocation5] }
   0xc   :  { %1183 = dma.done.wait [#allocation5], 16 }
   0xd   :  { %1184 = vsyncadd [#allocation5], 4294967280 }
   0xe   :  { %14 = sfence }
   0xf   :  { %15 = vsyncpa [#allocation8], 0  ;;  %s1235_s20 = smov 0  }
  0x10 LB: > { %s1241_s0 = sadd.s32 4294967295, %s1191_s20   ;;  %p1008_p5 = scmp.ge.s32.totalorder %s1191_s20, 1  ;;  %s1191_s20 = sphi %s1235_s20, %s21_s20  }
  0x11   : > { %p130_p6 = scmp.lt.s32.totalorder %s1191_s20, 3 }
  0x13   : > { %p131_p7 = pnand %p1008_p5, %p130_p6 }
  0x14   : > { %p1009_p8 = scmp.ne.s32.totalorder (!%p131_p7), %s1241_s0, 0 }
  0x15   : > { %134 = sbr.rel (%p131_p7) target bundleno = 893 (0x37d), region = 32 }
  0x1c   : > { %147 = sbr.rel (%p1009_p8) target bundleno = 193 (0xc1), region = 36  ;;  %v148_v0 = vld [vmem:[%s1698_s1] sm:$0xff] (!%p1009_p8)  ;;  %v149_v1 = vld [vmem:[%s1698_s1 + $0x8] sm:$0xff] (!%p1009_p8)  ;;  %vm164_vm0 = vcmask (!%p1009_p8), 130048   ;;  %v1194_v4 = vmov (!%p1009_p8), 0.0  }
  0x1d   : > { %v150_v2 = vmul.f32 (!%p1009_p8), %v148_v0, %v148_v0  ;;  %v151_v3 = vmul.f32 (!%p1009_p8), %v149_v1, %v149_v1  ;;  %165 = vst.msk [vmem:[#allocation3] sm:$0xff] (!%p1009_p8), %vm164_vm0, %v1194_v4  ;;  %166 = vst.msk [vmem:[#allocation3 + $0x8] sm:$0xff] (!%p1009_p8), %vm164_vm0, %v1194_v4 }
  0x1e   : > { %167 = vst.msk [vmem:[#allocation4] sm:$0xff] (!%p1009_p8), %vm164_vm0, %v1194_v4  ;;  %168 = vst.msk [vmem:[#allocation4 + $0x8] sm:$0xff] (!%p1009_p8), %vm164_vm0, %v1194_v4 }
  0x1f   : > { %152 = vadd.xlane.f32.xlu0 (!%p1009_p8), %v150_v2 }
  0x23   : > { %154 = vadd.xlane.f32.xlu0 %v151_v3 }
  0xac   : > { %v153_v5 = vpop.xlane.xlu0 %152 }
  0xad   : > { %v156_v6 = vmax.f32 %v153_v5, 1e-24 }
  0xaf   : > { %1069 = vrsqrt.f32 %v156_v6 }
  0xb0   : > { %v155_v7 = vpop.xlane.xlu0 %154 }
  0xb1   : > { %v157_v8 = vmax.f32 %v155_v7, 1e-24 }
  0xb3   : > { %1071 = vrsqrt.f32 %v157_v8 }
  0xb9   : > { %v1070_v9 = vpop.eup %1069 }
  0xba   : > { %v160_v10 = vmul.f32 %v1070_v9, %v148_v0 }
  0xbc   : > { %162 = vst [vmem:[#allocation2] sm:$0xff] %v160_v10 }
  0xbd   : > { %v1072_v11 = vpop.eup %1071 }
  0xbe   : > { %v161_v12 = vmul.f32 %v1072_v11, %v149_v1 }
  0xc0   : > { %163 = vst [vmem:[#allocation2 + $0x8] sm:$0xff] %v161_v12 }
  0xc1 PF: > { %s1253_s25 = sshll.u32 %s1241_s0, 3  ;;  %v1195_v15 = vmov 0.0|0.0   ;;  %vm1196_vm1 = vmmov 0   ;;  %v1197_v18 = vmov 0.0   ;;  %v1198_v19 = vmov 0   ;;  %v1269_v23 = vld [vmem:[%s1699_s2] sm:$0xff] }
  0xc2   : > { %1034 = vmatprep.subr.bf16.mxu0 %v1195_v15  ;;  %s172_s26 = scalar_lea.vmem [#allocation2], %s1253_s25  ;;  %1026 = vmatprep.mubr.msk.f32.mxu0 %vm1196_vm1, %v1197_v18  ;;  %s355_s27 = sld [smem:[#allocation6 + %s1253_s25]]  ;;  %v352_v20 = vlaneseq  ;;  %v1274_v24 = vld [vmem:[%s1699_s2 + $0x8] sm:$0xff]  ;;  %v359_v26 = vstv %s1253_s25  ;;  %v1199_v50 = vmov 4   ;;  %v1200_v8 = vmov 5  }
  0xc3   : > { %v169_v13 = vld [vmem:[#allocation2] sm:$0xff]  ;;  %1073 = vset.pattern.permute.xlu1 %v1198_v19  ;;  %1089 = vset.pattern.permute.xlu0 %v1198_v19  ;;  %s426_s28 = sadd.s32 1, %s1253_s25  ;;  %s496_s8 = sadd.s32 2, %s1253_s25  ;;  %v1201_v9 = vmov 1  }
  0xc4   : > { %1031 = vmatprep.mubr.f32.mxu1 %v169_v13  ;;  %v1260_v21 = vshrl.u32 %v352_v20, 7  ;;  %s427_s29 = sld [smem:[#allocation6 + %s426_s28]]  ;;  %v431_v30 = vstv %s426_s28  ;;  %s566_s10 = sadd.s32 3, %s1253_s25  ;;  %v501_v35 = vstv %s496_s8 }
  0xc5   : > { %s497_s9 = sld [smem:[#allocation6 + %s496_s8]]  ;;  %s636_s12 = sadd.s32 4, %s1253_s25  ;;  %v571_v41 = vstv %s566_s10 }
  0xc6   : > { %v1264_v22 = vadd.s32 8, %v1260_v21  ;;  %vm360_vm4 = vcmp.ne.s32.totalorder %v1260_v21, %v359_v26  ;;  %vm432_vm10 = vcmp.ne.s32.totalorder %v1260_v21, %v431_v30  ;;  %s567_s11 = sld [smem:[#allocation6 + %s566_s10]]  ;;  %vm502_vm0 = vcmp.ne.s32.totalorder %v1260_v21, %v501_v35  ;;  %s706_s14 = sadd.s32 5, %s1253_s25 }
  0xc7   : > { %v170_v14 = vld [vmem:[#allocation2 + $0x8] sm:$0xff]  ;;  %v173_v17 = vld [vmem:[%s172_s26] sm:$0xff]  ;;  %s637_s13 = sld [smem:[#allocation6 + %s636_s12]]  ;;  %v641_v45 = vstv %s636_s12  ;;  %s776_s16 = sadd.s32 6, %s1253_s25  ;;  %v711_v61 = vstv %s706_s14 }
  0xc8   : > { %v1035_v16 = vpack.c.bf16 %v170_v14, %v169_v13  ;;  %1029 = vmatprep.subr.mxu1 %v173_v17  ;;  %v1276_v25 = vstv %s355_s27  ;;  %vm361_vm5 = vcmp.ne.s32.totalorder %v1264_v22, %v359_v26  ;;  %vm433_vm11 = vcmp.ne.s32.totalorder %v1264_v22, %v431_v30  ;;  %s707_s15 = sld [smem:[#allocation6 + %s706_s14]]  ;;  %s846_s18 = sadd.s32 7, %s1253_s25 }
  0xc9   : > { %1030 = vmatpush3.xpose.msra.mxu1 %v173_v17  ;;  %vm357_vm2 = vcmp.eq.s32.totalorder %v1269_v23, %v1276_v25  ;;  %vm358_vm3 = vcmp.eq.s32.totalorder %v1274_v24, %v1276_v25  ;;  %vm503_vm1 = vcmp.ne.s32.totalorder %v1264_v22, %v501_v35  ;;  %s777_s17 = sld [smem:[#allocation6 + %s776_s16]]  ;;  %v781_v3 = vstv %s776_s16  ;;  %p1011_p9 = scmp.ne.s32.totalorder %s1241_s0, 1 }
  0xca   : > { %1036 = vmatpush3.bf16.xpose.msra.mxu0 %v1035_v16  ;;  %vm362_vm6 = vmand %vm357_vm2, %vm360_vm4  ;;  %v1288_v29 = vstv %s427_s29  ;;  %v1205_v30 = vmov 7   ;;  %s847_s19 = sld [smem:[#allocation6 + %s846_s18]] }
  0xcb   : > { %vm363_vm7 = vmand %vm358_vm3, %vm361_vm5  ;;  %v364_v27 = vsel %vm362_vm6, 1.0, %v1197_v18  ;;  %vm429_vm8 = vcmp.eq.s32.totalorder %v1269_v23, %v1288_v29  ;;  %vm430_vm9 = vcmp.eq.s32.totalorder %v1274_v24, %v1288_v29  ;;  %v1299_v34 = vstv %s497_s9 }
  0xcc   : > { %1032 = vmatmul.mubr.f32.vlgmr.msra.gmra.mrb[0].mxu1 %v170_v14  ;;  %v365_v28 = vsel %vm363_vm7, 1.0, %v1197_v18  ;;  %vm434_vm12 = vmand %vm429_vm8, %vm432_vm10  ;;  %vm499_vm14 = vcmp.eq.s32.totalorder %v1269_v23, %v1299_v34  ;;  %vm500_vm15 = vcmp.eq.s32.totalorder %v1274_v24, %v1299_v34  ;;  %v1310_v40 = vstv %s567_s11 }
  0xcd   : > { %v1074_v31 = vpack.i.bf16 %v365_v28, %v364_v27  ;;  %vm435_vm13 = vmand %vm430_vm9, %vm433_vm11  ;;  %v436_v32 = vsel %vm434_vm12, 1.0, %v1197_v18  ;;  %vm569_vm4 = vcmp.eq.s32.totalorder %v1269_v23, %v1310_v40  ;;  %vm570_vm5 = vcmp.eq.s32.totalorder %v1274_v24, %v1310_v40 }
  0xce   : > { %v437_v33 = vsel %vm435_vm13, 1.0, %v1197_v18  ;;  %vm504_vm2 = vmand %vm499_vm14, %vm502_vm0  ;;  %vm572_vm6 = vcmp.ne.s32.totalorder %v1260_v21, %v571_v41  ;;  %vm573_vm7 = vcmp.ne.s32.totalorder %v1264_v22, %v571_v41  ;;  %v1320_v44 = vstv %s637_s13 }
  0xcf   : > { %1075 = vperm.xlu1 %1073, %v1074_v31   ;;  %v1079_v36 = vpack.i.bf16 %v437_v33, %v436_v32  ;;  %vm505_vm3 = vmand %vm500_vm15, %vm503_vm1  ;;  %v506_v37 = vsel %vm504_vm2, 1.0, %v1197_v18  ;;  %vm639_vm10 = vcmp.eq.s32.totalorder %v1269_v23, %v1320_v44  ;;  %vm640_vm11 = vcmp.eq.s32.totalorder %v1274_v24, %v1320_v44 }
  0xd0   : > { %v507_v38 = vsel %vm505_vm3, 1.0, %v1197_v18  ;;  %vm574_vm8 = vmand %vm569_vm4, %vm572_vm6  ;;  %vm642_vm12 = vcmp.ne.s32.totalorder %v1260_v21, %v641_v45  ;;  %vm643_vm13 = vcmp.ne.s32.totalorder %v1264_v22, %v641_v45  ;;  %v1335_v60 = vstv %s707_s15  ;;  %v1377_v45 = vld [vmem:[%s1700_s3] sm:$0x1] }
  0xd1   : > { %1027 = vmatmul.mubr.f32.vlgmr.msra.gmra.mrb[0].mxu0 %v173_v17  ;;  %v1084_v39 = vpack.i.bf16 %v507_v38, %v506_v37  ;;  %vm575_vm9 = vmand %vm570_vm5, %vm573_vm7  ;;  %v576_v42 = vsel %vm574_vm8, 1.0, %v1197_v18  ;;  %vm709_vm0 = vcmp.eq.s32.totalorder %v1269_v23, %v1335_v60  ;;  %vm710_vm1 = vcmp.eq.s32.totalorder %v1274_v24, %v1335_v60 }
  0xd2   : > { %v577_v43 = vsel %vm575_vm9, 1.0, %v1197_v18  ;;  %vm644_vm14 = vmand %vm639_vm10, %vm642_vm12  ;;  %vm712_vm2 = vcmp.ne.s32.totalorder %v1260_v21, %v711_v61  ;;  %vm713_vm3 = vcmp.ne.s32.totalorder %v1264_v22, %v711_v61  ;;  %v1343_v2 = vstv %s777_s17 }
  0xd3   : > { %1080 = vperm.xlu1 %1073, %v1079_v36   ;;  %v1090_v46 = vpack.i.bf16 %v577_v43, %v576_v42  ;;  %vm645_vm15 = vmand %vm640_vm11, %vm643_vm13  ;;  %v646_v47 = vsel %vm644_vm14, 1.0, %v1197_v18  ;;  %vm779_vm8 = vcmp.eq.s32.totalorder %v1269_v23, %v1343_v2  ;;  %vm782_vm9 = vcmp.ne.s32.totalorder %v1260_v21, %v781_v3 }
  0xd4   : > { %v647_v48 = vsel %vm645_vm15, 1.0, %v1197_v18  ;;  %vm714_vm6 = vmand %vm709_vm0, %vm712_vm2  ;;  %vm780_vm10 = vcmp.eq.s32.totalorder %v1274_v24, %v1343_v2  ;;  %vm783_vm11 = vcmp.ne.s32.totalorder %v1264_v22, %v781_v3  ;;  %v1202_v14 = vmov 2  }
  0xd5   : > { %1091 = vperm.xlu0 %1089, %v1090_v46   ;;  %v1095_v49 = vpack.i.bf16 %v647_v48, %v646_v47  ;;  %vm715_vm7 = vmand %vm710_vm1, %vm713_vm3  ;;  %v716_v6 = vsel %vm714_vm6, 1.0, %v1197_v18  ;;  %v1203_v17 = vmov 3   ;;  %v1204_v28 = vmov 6  }
  0xd6   : > { %v717_v7 = vsel %vm715_vm7, 1.0, %v1197_v18  ;;  %vm784_vm12 = vmand %vm779_vm8, %vm782_vm9  ;;  %v1360_v31 = vstv %s847_s19  ;;  %v851_v32 = vstv %s846_s18  ;;  %vm366_vm8 = vcmp.ne.s32.totalorder %v1377_v45, %v1276_v25 }
  0xd7   : > { %1085 = vperm.xlu1 %1073, %v1084_v39   ;;  %vm785_vm13 = vmand %vm780_vm10, %vm783_vm11  ;;  %v1108_v10 = vpack.i.bf16 %v717_v7, %v716_v6  ;;  %v786_v11 = vsel %vm784_vm12, 1.0, %v1197_v18  ;;  %vm849_vm0 = vcmp.eq.s32.totalorder %v1269_v23, %v1360_v31  ;;  %vm852_vm1 = vcmp.ne.s32.totalorder %v1260_v21, %v851_v32 }
  0xd8   : > { %v787_v12 = vsel %vm785_vm13, 1.0, %v1197_v18  ;;  %vm850_vm2 = vcmp.eq.s32.totalorder %v1274_v24, %v1360_v31  ;;  %vm853_vm3 = vcmp.ne.s32.totalorder %v1264_v22, %v851_v32  ;;  %v652_v47 = vsub.s32 4, %v1260_v21 }
  0xd9   : > { %1096 = vperm.xlu0 %1089, %v1095_v49   ;;  %v1114_v15 = vpack.i.bf16 %v787_v12, %v786_v11  ;;  %v1387_v49 = vsub.s32 0, %v1260_v21  ;;  %vm438_vm9 = vcmp.ne.s32.totalorder %v1377_v45, %v1288_v29  ;;  %vm508_vm10 = vcmp.ne.s32.totalorder %v1377_v45, %v1299_v34 }
  0xda   : > { %vm578_vm11 = vcmp.ne.s32.totalorder %v1377_v45, %v1310_v40  ;;  %vm648_vm12 = vcmp.ne.s32.totalorder %v1377_v45, %v1320_v44  ;;  %v512_v6 = vsub.s32 2, %v1260_v21 }
  0xdb   : > { %1103 = vset.pattern.permute.xlu1 %v1199_v50  ;;  %v579_v34 = vsel %vm578_vm11, 1.0, %v1197_v18  ;;  %v649_v44 = vsel %vm648_vm12, 1.0, %v1197_v18 }
 0x14e   : > { %v1076_v22 = vpop.permute.xlu1 %1075 }
 0x152   : > { %v1081_v42 = vpop.permute.xlu1 %1080 }
 0x154   : > { %v1372_v41 = vpop.permute.xlu0 %1091 }
 0x158   : > { %v1381_v46 = vpop.permute.xlu0 %1096 }
 0x19f   : > { %v1033_v51 = vpop.f32.mrb[0].mxu1 }
 0x1a0   : > { %v330_v52 = vmul.f32 2.0, %v1033_v51  ;;  %v310_v53 = vpop.f32.mrb[1].mxu1  ;;  %v367_v51 = vsel %vm366_vm8, 1.0, %v1197_v18 }
 0x1a1   : > { %v329_v58 = vmul.f32 2.0, %v310_v53  ;;  %v509_v53 = vsel %vm508_vm10, 1.0, %v1197_v18  ;;  %v398_v29 = vrot.slane %v367_v51, %v1387_v49 }
 0x1a2   : > { %v332_v54 = vsub.f32 2.0, %v330_v52  ;;  %v439_v52 = vsel %vm438_vm9, 1.0, %v1197_v18 }
 0x1a3   : > { %v331_v59 = vsub.f32 2.0, %v329_v58  ;;  %v442_v58 = vsub.s32 1, %v1260_v21 }
 0x1a4   : > { %v1332_v55 = vpop.f32.mrb[0].mxu0  ;;  %v334_v57 = vmax.f32 %v332_v54, 0.0  ;;  %v1078_v54 = vunpack.i.h.bf16 %v1076_v22 }
 0x1a5   : > { %v1028_v56 = vpop.f32.mrb[1].mxu0  ;;  %v333_v62 = vmax.f32 %v331_v59, 0.0  ;;  %v319_v23 = vmul.f32 2.0, %v1332_v55  ;;  %v468_v59 = vrot.slane %v439_v52, %v1387_v49 }
 0x1a6   : > { %1133 = vrsqrt.f32 %v334_v57  ;;  %vm344_vm4 = vcmp.eq.f32.partialorder %v334_v57, inf  ;;  %v347_v1 = vand.u32 2147483648, %v334_v57  ;;  %vm346_vm5 = vcmp.eq.f32.partialorder %v334_v57, 0.0 }
 0x1a7   : > { %1135 = vrsqrt.f32 %v333_v62  ;;  %vm337_vm14 = vcmp.eq.f32.partialorder %v333_v62, inf  ;;  %v340_v26 = vand.u32 2147483648, %v333_v62  ;;  %vm339_vm15 = vcmp.eq.f32.partialorder %v333_v62, 0.0 }
 0x1a8   : > { %v320_v37 = vsub.f32 2.0, %v319_v23  ;;  %v401_v3 = vmul.f32 %v1078_v54, %v398_v29 }
 0x1aa   : > { %v321_v24 = vmax.f32 %v320_v37, 0.0  ;;  %v582_v37 = vsub.s32 3, %v1260_v21 }
 0x1ac   : > { %1137 = vrsqrt.f32 %v321_v24  ;;  %vm324_vm6 = vcmp.eq.f32.partialorder %v321_v24, inf  ;;  %v327_v43 = vand.u32 2147483648, %v321_v24  ;;  %vm326_vm7 = vcmp.eq.f32.partialorder %v321_v24, 0.0 }
 0x1b0   : > { %v1134_v63 = vpop.eup %1133 }
 0x1b1   : > { %v343_v0 = vmul.f32 %v1134_v63, %v334_v57  ;;  %v1136_v13 = vpop.eup %1135  ;;  %v1082_v63 = vunpack.i.l.bf16 %v1081_v42 }
 0x1b2   : > { %v336_v16 = vmul.f32 %v1136_v13, %v333_v62  ;;  %v1094_v13 = vunpack.i.h.bf16 %v1372_v41 }
 0x1b3   : > { %v345_v4 = vsel %vm344_vm4, %v334_v57, %v343_v0  ;;  %vm854_vm4 = vmand %vm849_vm0, %vm852_vm1  ;;  %v1077_v57 = vunpack.i.l.bf16 %v1076_v22  ;;  %v538_v0 = vrot.slane %v509_v53, %v1387_v49  ;;  %vm718_vm1 = vcmp.ne.s32.totalorder %v1377_v45, %v1335_v60 }
 0x1b4   : > { %v348_v5 = vsel %vm346_vm5, %v347_v1, %v345_v4  ;;  %v338_v20 = vsel %vm337_vm14, %v333_v62, %v336_v16  ;;  %vm855_vm5 = vmand %vm850_vm2, %vm853_vm3  ;;  %v856_v33 = vsel %vm854_vm4, 1.0, %v1197_v18  ;;  %v1083_v62 = vunpack.i.h.bf16 %v1081_v42 }
 0x1b5   : > { %659 = vperm.xlu1 %1103, %v348_v5   ;;  %379 = vperm.xlu0 %1089, %v348_v5   ;;  %v341_v27 = vsel %vm339_vm15, %v340_v26, %v338_v20  ;;  %v857_v35 = vsel %vm855_vm5, 1.0, %v1197_v18  ;;  %v608_v1 = vrot.slane %v579_v34, %v1387_v49  ;;  %v678_v4 = vrot.slane %v649_v44, %v1387_v49 }
 0x1b6   : > { %v1127_v36 = vpack.i.bf16 %v857_v35, %v856_v33  ;;  %v1138_v38 = vpop.eup %1137  ;;  %v1422_v7 = vmul.f32 %v1077_v57, %v398_v29  ;;  %v1433_v16 = vmul.f32 %v1082_v63, %v468_v59  ;;  %v722_v20 = vsub.s32 5, %v1260_v21 }
 0x1b7   : > { %v323_v39 = vmul.f32 %v1138_v38, %v321_v24  ;;  %vm788_vm3 = vcmp.ne.s32.totalorder %v1377_v45, %v1343_v2  ;;  %v1454_v33 = vmul.f32 %v1094_v13, %v608_v1  ;;  %v719_v2 = vsel %vm718_vm1, 1.0, %v1197_v18 }
 0x1b8   : > { %vm858_vm5 = vcmp.ne.s32.totalorder %v1377_v45, %v1360_v31  ;;  %v792_v42 = vsub.s32 6, %v1260_v21  ;;  %v862_v60 = vsub.s32 7, %v1260_v21  ;;  %v748_v31 = vrot.slane %v719_v2, %v1387_v49 }
 0x1b9   : > { %1104 = vset.pattern.permute.xlu1 %v1200_v8  ;;  %1100 = vset.pattern.permute.xlu0 %v1201_v9 }
 0x1ba   : > { %729 = vperm.xlu1 %1104, %v348_v5   ;;  %449 = vperm.xlu0 %1100, %v348_v5  }
 0x1be   : > { %1107 = vset.pattern.permute.xlu1 %v1198_v19  ;;  %1101 = vset.pattern.permute.xlu0 %v1202_v14 }
 0x1bf   : > { %1109 = vperm.xlu1 %1107, %v1108_v10   ;;  %519 = vperm.xlu0 %1101, %v348_v5  }
 0x1c3   : > { %1115 = vperm.xlu1 %1107, %v1114_v15   ;;  %1102 = vset.pattern.permute.xlu0 %v1203_v17  ;;  %v1431_v15 = vmul.f32 %v1083_v62, %v468_v59 }
 0x1c4   : > { %589 = vperm.xlu0 %1102, %v348_v5  }
 0x1c7   : > { %1119 = vset.pattern.permute.xlu1 %v1201_v9 }
 0x1c8   : > { %1105 = vset.pattern.permute.xlu0 %v1198_v19  ;;  %445 = vperm.xlu1 %1119, %v341_v27  }
 0x1c9   : > { %374 = vperm.xlu0 %1105, %v341_v27  }
 0x1cc   : > { %1120 = vset.pattern.permute.xlu1 %v1202_v14  ;;  %v1093_v14 = vunpack.i.l.bf16 %v1372_v41  ;;  %v789_v41 = vsel %vm788_vm3, 1.0, %v1197_v18 }
 0x1cd   : > { %515 = vperm.xlu1 %1120, %v341_v27   ;;  %1106 = vset.pattern.permute.xlu0 %v1204_v28  ;;  %v1496_v51 = vrot.slane %v789_v41, %v1387_v49 }
 0x1ce   : > { %799 = vperm.xlu0 %1106, %v348_v5   ;;  %v1456_v35 = vmul.f32 %v1093_v14, %v608_v1 }
 0x1d1   : > { %1121 = vset.pattern.permute.xlu1 %v1203_v17  ;;  %v1099_v17 = vunpack.i.h.bf16 %v1381_v46 }
 0x1d2   : > { %585 = vperm.xlu1 %1121, %v341_v27   ;;  %1113 = vset.pattern.permute.xlu0 %v1205_v30 }
 0x1d3   : > { %869 = vperm.xlu0 %1113, %v348_v5  }
 0x1d6   : > { %1122 = vset.pattern.permute.xlu1 %v1199_v50  ;;  %v1086_v50 = vpop.permute.xlu1 %1085 }
 0x1d7   : > { %655 = vperm.xlu1 %1122, %v341_v27   ;;  %1132 = vset.pattern.permute.xlu0 %v1198_v19  ;;  %v1087_v9 = vunpack.i.l.bf16 %v1086_v50 }
 0x1d9   : > { %v1452_v32 = vmul.f32 %v1087_v9, %v538_v0 }
 0x1db   : > { %1123 = vset.pattern.permute.xlu1 %v1200_v8  ;;  %v1088_v8 = vunpack.i.h.bf16 %v1086_v50 }
 0x1dc   : > { %725 = vperm.xlu1 %1123, %v341_v27  }
 0x1e0   : > { %1124 = vset.pattern.permute.xlu1 %v1204_v28  ;;  %v1098_v28 = vunpack.i.l.bf16 %v1381_v46 }
 0x1e1   : > { %795 = vperm.xlu1 %1124, %v341_v27  }
 0x1e5   : > { %1125 = vset.pattern.permute.xlu1 %v1205_v30 }
 0x1e6   : > { %865 = vperm.xlu1 %1125, %v341_v27   ;;  %v1444_v27 = vmul.f32 %v1088_v8, %v538_v0 }
 0x1ea   : > { %1126 = vset.pattern.permute.xlu1 %v1198_v19  ;;  %v325_v19 = vsel %vm324_vm6, %v321_v24, %v323_v39  ;;  %v681_v24 = vmul.f32 %v1099_v17, %v678_v4 }
 0x1eb   : > { %1128 = vperm.xlu1 %1126, %v1127_v36   ;;  %v1384_v48 = vsel %vm326_vm7, %v327_v43, %v325_v19  ;;  %v1480_v43 = vmul.f32 %v1098_v28, %v678_v4 }
 0x1ec   : > { %v1399_v25 = vrot.slane %v1384_v48, %v652_v47  ;;  %v1407_v40 = vrot.slane %v1384_v48, %v1387_v49  ;;  %v1425_v12 = vrot.slane %v1384_v48, %v442_v58  ;;  %v1442_v26 = vrot.slane %v1384_v48, %v512_v6 }
 0x1ed   : > { %v1466_v22 = vrot.slane %v1384_v48, %v722_v20  ;;  %v1490_v46 = vrot.slane %v1384_v48, %v582_v37  ;;  %v859_v47 = vsel %vm858_vm5, 1.0, %v1197_v18  ;;  %v1504_v53 = vrot.slane %v1384_v48, %v792_v42 }
 0x1ee   : > { %v1508_v34 = vrot.slane %v1384_v48, %v862_v60 }
 0x234   : > { %v660_v55 = vpop.permute.xlu1 %659  ;;  %v380_v56 = vpop.permute.xlu0 %379 }
 0x235   : > { %v1413_v61 = vsub.f32 %v1399_v25, %v660_v55  ;;  %v1419_v5 = vsub.f32 %v1407_v40, %v380_v56  ;;  %v1511_v55 = vrot.slane %v859_v47, %v1387_v49 }
 0x237   : > { %vm683_vm13 = vcmp.gt.f32.partialorder %v1413_v61, 0.0  ;;  %vm685_vm14 = vcmp.le.f32.partialorder %v1413_v61, 0.1  ;;  %vm403_vm15 = vcmp.gt.f32.partialorder %v1419_v5, 0.0  ;;  %vm405_vm0 = vcmp.le.f32.partialorder %v1419_v5, 0.1 }
 0x238   : > { %vm687_vm2 = vmand %vm683_vm13, %vm685_vm14  ;;  %vm699_vm8 = vcmp.lt.f32.partialorder %v1413_v61, 0.1  ;;  %vm419_vm9 = vcmp.lt.f32.partialorder %v1419_v5, 0.1  ;;  %v693_v29 = vsub.f32 0.1, %v1413_v61 }
 0x239   : > { %v730_v10 = vpop.permute.xlu1 %729  ;;  %v450_v11 = vpop.permute.xlu0 %449  ;;  %vm407_vm4 = vmand %vm403_vm15, %vm405_vm0  ;;  %v689_v38 = vsel %vm687_vm2, 1.0, %v1197_v18  ;;  %v701_v56 = vsel %vm699_vm8, 1.0, %v1197_v18  ;;  %v413_v57 = vsub.f32 0.1, %v1419_v5  ;;  %v421_v44 = vsel %vm419_vm9, 1.0, %v1197_v18 }
 0x23a   : > { %v1448_v30 = vsub.f32 %v1425_v12, %v450_v11  ;;  %v409_v19 = vsel %vm407_vm4, 1.0, %v1197_v18  ;;  %v691_v50 = vmul.f32 %v689_v38, %v681_v24  ;;  %v1499_v52 = vsub.f32 %v1466_v22, %v730_v10 }
 0x23b   : > { %v411_v54 = vmul.f32 %v409_v19, %v401_v3 }
 0x23c   : > { %vm473_vm6 = vcmp.gt.f32.partialorder %v1448_v30, 0.0  ;;  %vm475_vm7 = vcmp.le.f32.partialorder %v1448_v30, 0.1  ;;  %v1517_v59 = vmul.f32 %v693_v29, %v691_v50  ;;  %v1519_v62 = vmul.f32 %v701_v56, %v691_v50 }
 0x23d   : > { %vm477_vm10 = vmand %vm473_vm6, %vm475_vm7  ;;  %vm753_vm14 = vcmp.gt.f32.partialorder %v1499_v52, 0.0  ;;  %vm755_vm15 = vcmp.le.f32.partialorder %v1499_v52, 0.1  ;;  %v415_v0 = vmul.f32 %v413_v57, %v411_v54  ;;  %vm489_vm2 = vcmp.lt.f32.partialorder %v1448_v30, 0.1 }
 0x23e   : > { %v1458_v36 = vpop.permute.xlu1 %1109  ;;  %v520_v23 = vpop.permute.xlu0 %519  ;;  %v479_v61 = vsel %vm477_vm10, 1.0, %v1197_v18  ;;  %v423_v4 = vmul.f32 %v421_v44, %v411_v54  ;;  %v763_v5 = vsub.f32 0.1, %v1499_v52  ;;  %vm769_vm4 = vcmp.lt.f32.partialorder %v1499_v52, 0.1  ;;  %vm757_vm5 = vmand %vm753_vm14, %vm755_vm15 }
 0x23f   : > { %v1476_v39 = vsub.f32 %v1442_v26, %v520_v23  ;;  %v1112_v48 = vunpack.i.h.bf16 %v1458_v36  ;;  %v481_v6 = vmul.f32 %v479_v61, %v1431_v15  ;;  %v483_v9 = vsub.f32 0.1, %v1448_v30 }
 0x240   : > { %v1111_v11 = vunpack.i.l.bf16 %v1458_v36  ;;  %v759_v28 = vsel %vm757_vm5, 1.0, %v1197_v18  ;;  %v771_v30 = vsel %vm769_vm4, 1.0, %v1197_v18 }
 0x241   : > { %vm543_vm11 = vcmp.gt.f32.partialorder %v1476_v39, 0.0  ;;  %vm545_vm12 = vcmp.le.f32.partialorder %v1476_v39, 0.1  ;;  %v751_v10 = vmul.f32 %v1112_v48, %v748_v31  ;;  %vm559_vm8 = vcmp.lt.f32.partialorder %v1476_v39, 0.1 }
 0x242   : > { %v1487_v45 = vpop.permute.xlu1 %1115  ;;  %vm547_vm13 = vmand %vm543_vm11, %vm545_vm12  ;;  %v485_v17 = vmul.f32 %v483_v9, %v481_v6  ;;  %v1556_v36 = vmul.f32 %v1111_v11, %v748_v31  ;;  %v561_v2 = vsel %vm559_vm8, 1.0, %v1197_v18 }
 0x243   : > { %v590_v21 = vpop.permute.xlu0 %589  ;;  %v549_v8 = vsel %vm547_vm13, 1.0, %v1197_v18  ;;  %v761_v23 = vmul.f32 %v759_v28, %v751_v10  ;;  %v1118_v42 = vunpack.i.h.bf16 %v1487_v45  ;;  %v1117_v29 = vunpack.i.l.bf16 %v1487_v45 }
 0x244   : > { %v593_v58 = vsub.f32 %v1490_v46, %v590_v21  ;;  %v551_v14 = vmul.f32 %v549_v8, %v1444_v27  ;;  %v553_v27 = vsub.f32 0.1, %v1476_v39  ;;  %v487_v31 = vadd.f32 %v485_v17, %v415_v0 }
 0x245   : > { %v765_v56 = vmul.f32 %v763_v5, %v761_v23  ;;  %v1606_v5 = vmul.f32 %v1117_v29, %v1496_v51 }
 0x246   : > { %vm613_vm0 = vcmp.gt.f32.partialorder %v593_v58, 0.0  ;;  %vm615_vm1 = vcmp.le.f32.partialorder %v593_v58, 0.1  ;;  %vm629_vm12 = vcmp.lt.f32.partialorder %v593_v58, 0.1  ;;  %v555_v39 = vmul.f32 %v553_v27, %v551_v14 }
 0x247   : > { %v446_v49 = vpop.permute.xlu1 %445  ;;  %vm617_vm3 = vmand %vm613_vm0, %vm615_vm1  ;;  %v623_v60 = vsub.f32 0.1, %v593_v58  ;;  %v631_v21 = vsel %vm629_vm12, 1.0, %v1197_v18 }
 0x248   : > { %v375_v63 = vpop.permute.xlu0 %374  ;;  %v1529_v1 = vsub.f32 %v1425_v12, %v446_v49  ;;  %v619_v12 = vsel %vm617_vm3, 1.0, %v1197_v18  ;;  %v557_v57 = vadd.f32 %v555_v39, %v487_v31  ;;  %v1593_v49 = vmul.f32 %v771_v30, %v761_v23 }
 0x249   : > { %v1532_v3 = vsub.f32 %v1407_v40, %v375_v63  ;;  %v491_v40 = vsel %vm489_vm2, 1.0, %v1197_v18  ;;  %v621_v37 = vmul.f32 %v619_v12, %v1454_v33  ;;  %v563_v33 = vmul.f32 %v561_v2, %v551_v14 }
 0x24a   : > { %vm472_vm6 = vcmp.gt.f32.partialorder %v1529_v1, 0.0  ;;  %vm474_vm7 = vcmp.le.f32.partialorder %v1529_v1, 0.1  ;;  %v493_v20 = vmul.f32 %v491_v40, %v481_v6  ;;  %vm488_vm3 = vcmp.lt.f32.partialorder %v1529_v1, 0.1 }
 0x24b   : > { %vm402_vm9 = vcmp.gt.f32.partialorder %v1532_v3, 0.0  ;;  %vm404_vm10 = vcmp.le.f32.partialorder %v1532_v3, 0.1  ;;  %vm1564_vm11 = vmand %vm472_vm6, %vm474_vm7  ;;  %v625_v50 = vmul.f32 %v623_v60, %v621_v37  ;;  %v633_v54 = vmul.f32 %v631_v21, %v621_v37 }
 0x24c   : > { %v516_v13 = vpop.permute.xlu1 %515  ;;  %vm406_vm13 = vmand %vm402_vm9, %vm404_vm10  ;;  %v495_v47 = vadd.f32 %v493_v20, %v423_v4  ;;  %vm418_vm4 = vcmp.lt.f32.partialorder %v1532_v3, 0.1  ;;  %v482_v0 = vsub.f32 0.1, %v1529_v1  ;;  %v412_v4 = vsub.f32 0.1, %v1532_v3 }
 0x24d   : > { %v800_v15 = vpop.permute.xlu0 %799  ;;  %v1570_v38 = vsub.f32 %v1442_v26, %v516_v13  ;;  %v478_v26 = vsel %vm1564_vm11, 1.0, %v1197_v18  ;;  %v408_v52 = vsel %vm406_vm13, 1.0, %v1197_v18  ;;  %v627_v63 = vadd.f32 %v625_v50, %v557_v57 }
 0x24e   : > { %v1573_v41 = vsub.f32 %v1504_v53, %v800_v15  ;;  %v565_v44 = vadd.f32 %v563_v33, %v495_v47  ;;  %v480_v61 = vmul.f32 %v478_v26, %v1433_v16  ;;  %v410_v48 = vmul.f32 %v408_v52, %v1422_v7 }
 0x24f   : > { %vm542_vm14 = vcmp.gt.f32.partialorder %v1570_v38, 0.0  ;;  %vm544_vm15 = vcmp.le.f32.partialorder %v1570_v38, 0.1  ;;  %v821_v7 = vmul.f32 %v1118_v42, %v1496_v51  ;;  %v490_v1 = vsel %vm488_vm3, 1.0, %v1197_v18 }
 0x250   : > { %vm823_vm0 = vcmp.gt.f32.partialorder %v1573_v41, 0.0  ;;  %vm825_vm1 = vcmp.le.f32.partialorder %v1573_v41, 0.1  ;;  %vm546_vm2 = vmand %vm542_vm14, %vm544_vm15  ;;  %v635_v16 = vadd.f32 %v633_v54, %v565_v44  ;;  %v420_v3 = vsel %vm418_vm4, 1.0, %v1197_v18 }
 0x251   : > { %v586_v19 = vpop.permute.xlu1 %585  ;;  %vm827_vm5 = vmand %vm823_vm0, %vm825_vm1  ;;  %v484_v6 = vmul.f32 %v482_v0, %v480_v61  ;;  %v414_v8 = vmul.f32 %v412_v4, %v410_v48  ;;  %v492_v11 = vmul.f32 %v490_v1, %v480_v61  ;;  %v422_v40 = vmul.f32 %v420_v3, %v410_v48 }
 0x252   : > { %v1587_v58 = vsub.f32 %v1490_v46, %v586_v19  ;;  %v548_v46 = vsel %vm546_vm2, 1.0, %v1197_v18  ;;  %v829_v9 = vsel %vm827_vm5, 1.0, %v1197_v18  ;;  %vm558_vm8 = vcmp.lt.f32.partialorder %v1570_v38, 0.1 }
 0x253   : > { %v550_v12 = vmul.f32 %v548_v46, %v1452_v32  ;;  %v697_v51 = vadd.f32 %v1517_v59, %v627_v63  ;;  %v705_v14 = vadd.f32 %v1519_v62, %v635_v16  ;;  %v552_v15 = vsub.f32 0.1, %v1570_v38 }
 0x254   : > { %vm612_vm6 = vcmp.gt.f32.partialorder %v1587_v58, 0.0  ;;  %vm614_vm7 = vcmp.le.f32.partialorder %v1587_v58, 0.1  ;;  %v831_v17 = vmul.f32 %v829_v9, %v821_v7  ;;  %vm839_vm12 = vcmp.lt.f32.partialorder %v1573_v41, 0.1 }
 0x255   : > { %vm616_vm9 = vmand %vm612_vm6, %vm614_vm7  ;;  %v486_v32 = vadd.f32 %v484_v6, %v414_v8  ;;  %v560_v28 = vsel %vm558_vm8, 1.0, %v1197_v18  ;;  %v833_v30 = vsub.f32 0.1, %v1573_v41  ;;  %v554_v27 = vmul.f32 %v552_v15, %v550_v12 }
 0x256   : > { %v656_v45 = vpop.permute.xlu1 %655  ;;  %v618_v23 = vsel %vm616_vm9, 1.0, %v1197_v18  ;;  %v562_v59 = vmul.f32 %v560_v28, %v550_v12  ;;  %v494_v62 = vadd.f32 %v492_v11, %v422_v40  ;;  %v841_v37 = vsel %vm839_vm12, 1.0, %v1197_v18 }
 0x257   : > { %v662_v10 = vsub.f32 %v1399_v25, %v656_v45  ;;  %v870_v25 = vpop.permute.xlu0 %869  ;;  %v835_v38 = vmul.f32 %v833_v30, %v831_v17  ;;  %v620_v39 = vmul.f32 %v618_v23, %v1456_v35  ;;  %vm628_vm1 = vcmp.lt.f32.partialorder %v1587_v58, 0.1  ;;  %v916_v23 = vld [vmem:[#allocation3] sm:$0xff] }
 0x258   : > { %v1624_v24 = vsub.f32 %v1508_v34, %v870_v25  ;;  %v767_v41 = vadd.f32 %v765_v56, %v697_v51  ;;  %v843_v33 = vmul.f32 %v841_v37, %v831_v17  ;;  %v622_v42 = vsub.f32 0.1, %v1587_v58 }
 0x259   : > { %vm682_vm10 = vcmp.gt.f32.partialorder %v662_v10, 0.0  ;;  %vm684_vm11 = vcmp.le.f32.partialorder %v662_v10, 0.1  ;;  %vm698_vm2 = vcmp.lt.f32.partialorder %v662_v10, 0.1  ;;  %v556_v19 = vadd.f32 %v554_v27, %v486_v32 }
 0x25a   : > { %vm686_vm13 = vmand %vm682_vm10, %vm684_vm11  ;;  %v564_v31 = vadd.f32 %v562_v59, %v494_v62  ;;  %v630_v21 = vsel %vm628_vm1, 1.0, %v1197_v18  ;;  %vm893_vm5 = vcmp.gt.f32.partialorder %v1624_v24, 0.0  ;;  %v624_v35 = vmul.f32 %v622_v42, %v620_v39 }
 0x25b   : > { %v726_v13 = vpop.permute.xlu1 %725  ;;  %v688_v2 = vsel %vm686_vm13, 1.0, %v1197_v18  ;;  %v632_v26 = vmul.f32 %v630_v21, %v620_v39  ;;  %v692_v52 = vsub.f32 0.1, %v662_v10  ;;  %v700_v29 = vsel %vm698_vm2, 1.0, %v1197_v18 }
 0x25c   : > { %v732_v20 = vsub.f32 %v1466_v22, %v726_v13  ;;  %v690_v47 = vmul.f32 %v688_v2, %v1480_v43  ;;  %vm895_vm8 = vcmp.le.f32.partialorder %v1624_v24, 0.1  ;;  %v626_v48 = vadd.f32 %v624_v35, %v556_v19  ;;  %v917_v2 = vld [vmem:[#allocation3 + $0x8] sm:$0xff] }
 0x25d   : > { %v837_v63 = vadd.f32 %v835_v38, %v767_v41  ;;  %v634_v0 = vadd.f32 %v632_v26, %v564_v31  ;;  %vm1645_vm12 = vmand %vm893_vm5, %vm895_vm8  ;;  %v924_v38 = vld [vmem:[#allocation4 + $0x8] sm:$0xff]  ;;  %vm968_vm1 = vcmask (!%p1011_p9), 0  }
 0x25e   : > { %vm752_vm14 = vcmp.gt.f32.partialorder %v732_v20, 0.0  ;;  %vm754_vm15 = vcmp.le.f32.partialorder %v732_v20, 0.1  ;;  %vm768_vm7 = vcmp.lt.f32.partialorder %v732_v20, 0.1  ;;  %v694_v57 = vmul.f32 %v692_v52, %v690_v47 }
 0x25f   : > { %vm756_vm0 = vmand %vm752_vm14, %vm754_vm15  ;;  %v702_v44 = vmul.f32 %v700_v29, %v690_v47  ;;  %v762_v58 = vsub.f32 0.1, %v732_v20  ;;  %v770_v45 = vsel %vm768_vm7, 1.0, %v1197_v18  ;;  %vm909_vm15 = vcmp.lt.f32.partialorder %v1624_v24, 0.1 }
 0x260   : > { %v796_v22 = vpop.permute.xlu1 %795  ;;  %v758_v50 = vsel %vm756_vm0, 1.0, %v1197_v18  ;;  %v903_v20 = vsub.f32 0.1, %v1624_v24  ;;  %v911_v30 = vsel %vm909_vm15, 1.0, %v1197_v18  ;;  %vm920_vm0 = vcmask 130048  }
 0x261   : > { %v802_v60 = vsub.f32 %v1504_v53, %v796_v22  ;;  %v760_v53 = vmul.f32 %v758_v50, %v1556_v36  ;;  %v775_v36 = vadd.f32 %v1593_v49, %v705_v14  ;;  %v696_v49 = vadd.f32 %v694_v57, %v626_v48  ;;  %v923_v22 = vld [vmem:[#allocation4] sm:$0xff] }
 0x262   : > { %v704_v8 = vadd.f32 %v702_v44, %v634_v0  ;;  %v899_v14 = vsel %vm1645_vm12, 1.0, %v1197_v18 }
 0x263   : > { %vm822_vm3 = vcmp.gt.f32.partialorder %v802_v60, 0.0  ;;  %vm824_vm4 = vcmp.le.f32.partialorder %v802_v60, 0.1  ;;  %vm838_vm9 = vcmp.lt.f32.partialorder %v802_v60, 0.1  ;;  %v764_v4 = vmul.f32 %v762_v58, %v760_v53 }
 0x264   : > { %vm826_vm6 = vmand %vm822_vm3, %vm824_vm4  ;;  %v772_v16 = vmul.f32 %v770_v45, %v760_v53  ;;  %v845_v6 = vadd.f32 %v843_v33, %v775_v36 }
 0x265   : > { %v866_v54 = vpop.permute.xlu1 %865  ;;  %v828_v43 = vsel %vm826_vm6, 1.0, %v1197_v18  ;;  %v766_v12 = vadd.f32 %v764_v4, %v696_v49 }
 0x266   : > { %v872_v56 = vsub.f32 %v1508_v34, %v866_v54  ;;  %v830_v61 = vmul.f32 %v828_v43, %v1606_v5  ;;  %v832_v34 = vsub.f32 0.1, %v802_v60  ;;  %v840_v5 = vsel %vm838_vm9, 1.0, %v1197_v18 }
 0x267   : > { %v774_v13 = vadd.f32 %v772_v16, %v704_v8 }
 0x268   : > { %vm892_vm10 = vcmp.gt.f32.partialorder %v872_v56, 0.0  ;;  %vm894_vm11 = vcmp.le.f32.partialorder %v872_v56, 0.1  ;;  %v834_v9 = vmul.f32 %v832_v34, %v830_v61  ;;  %v842_v10 = vmul.f32 %v840_v5, %v830_v61 }
 0x269   : > { %vm896_vm13 = vmand %vm892_vm10, %vm894_vm11  ;;  %vm908_vm14 = vcmp.lt.f32.partialorder %v872_v56, 0.1  ;;  %v902_v25 = vsub.f32 0.1, %v872_v56 }
 0x26a   : > { %v1129_v46 = vpop.permute.xlu1 %1128  ;;  %v898_v51 = vsel %vm896_vm13, 1.0, %v1197_v18  ;;  %v836_v32 = vadd.f32 %v834_v9, %v766_v12  ;;  %v844_v28 = vadd.f32 %v842_v10, %v774_v13 }
 0x26b   : > { %v1131_v1 = vunpack.i.h.bf16 %v1129_v46  ;;  %v1130_v3 = vunpack.i.l.bf16 %v1129_v46 }
 0x26d   : > { %v891_v11 = vmul.f32 %v1131_v1, %v1511_v55  ;;  %v890_v40 = vmul.f32 %v1130_v3, %v1511_v55  ;;  %v910_v55 = vsel %vm908_vm14, 1.0, %v1197_v18 }
 0x26f   : > { %v900_v15 = vmul.f32 %v898_v51, %v890_v40  ;;  %v901_v17 = vmul.f32 %v899_v14, %v891_v11 }
 0x271   : > { %v904_v27 = vmul.f32 %v902_v25, %v900_v15  ;;  %v905_v59 = vmul.f32 %v903_v20, %v901_v17  ;;  %v912_v62 = vmul.f32 %v910_v55, %v900_v15  ;;  %v913_v37 = vmul.f32 %v911_v30, %v901_v17 }
 0x272   : > { %932 = sbr.rel (%p1011_p9) target bundleno = 868 (0x364), region = 40 }
 0x273   : > { %v906_v39 = vadd.f32 %v904_v27, %v836_v32  ;;  %v907_v41 = vadd.f32 %v905_v59, %v837_v63  ;;  %v914_v33 = vadd.f32 %v912_v62, %v844_v28  ;;  %v915_v42 = vadd.f32 %v913_v37, %v845_v6 }
 0x275   : > { %v918_v24 = vadd.f32 %v916_v23, %v906_v39  ;;  %v919_v60 = vadd.f32 %v917_v2, %v907_v41  ;;  %v925_v19 = vadd.f32 %v923_v22, %v914_v33  ;;  %v926_v31 = vadd.f32 %v924_v38, %v915_v42 }
 0x277   : > { %921 = vst.msk [vmem:[#allocation3] sm:$0xff] %vm920_vm0, %v918_v24  ;;  %922 = vst.msk [vmem:[#allocation3 + $0x8] sm:$0xff] %vm920_vm0, %v919_v60 }
 0x278   : > { %927 = vst.msk [vmem:[#allocation4] sm:$0xff] %vm920_vm0, %v925_v19  ;;  %928 = vst.msk [vmem:[#allocation4 + $0x8] sm:$0xff] %vm920_vm0, %v926_v31 }
 0x27e   : > { %v933_v18 = vld [vmem:[#allocation3] sm:$0xff]  ;;  %v934_v47 = vld [vmem:[#allocation3 + $0x8] sm:$0xff] }
 0x27f   : > { %v948_v50 = vld [vmem:[#allocation4] sm:$0xff]  ;;  %v935_v21 = vsel %vm920_vm0, %v933_v18, 0.0  ;;  %v936_v35 = vsel %vm920_vm0, %v934_v47, 0.0  ;;  %v949_v26 = vld [vmem:[#allocation4 + $0x8] sm:$0xff] }
 0x280   : > { %v950_v52 = vsel %vm920_vm0, %v948_v50, 0.0  ;;  %v937_v29 = vadd.f32 %v936_v35, %v935_v21  ;;  %v951_v54 = vsel %vm920_vm0, %v949_v26, 0.0 }
 0x281   : > { %v952_v53 = vadd.f32 %v951_v54, %v950_v52 }
 0x282   : > { %938 = vadd.xlane.f32.xlu0 %v937_v29 }
 0x286   : > { %953 = vadd.xlane.f32.xlu0 %v952_v53 }
 0x30f   : > { %v939_v43 = vpop.xlane.xlu0 %938 }
 0x310   : > { %v940_v56 = vrot.slane %v939_v43, 4 }
 0x312   : > { %v941_v57 = vadd.f32 %v940_v56, %v939_v43 }
 0x313   : > { %v954_v44 = vpop.xlane.xlu0 %953 }
 0x314   : > { %v942_v58 = vrot.slane %v941_v57, 2  ;;  %v955_v61 = vrot.slane %v954_v44, 4 }
 0x316   : > { %v956_v48 = vadd.f32 %v955_v61, %v954_v44  ;;  %v943_v45 = vadd.f32 %v942_v58, %v941_v57 }
 0x318   : > { %v957_v36 = vrot.slane %v956_v48, 2  ;;  %v944_v63 = vrot.slane %v943_v45, 1 }
 0x31a   : > { %v958_v0 = vadd.f32 %v957_v36, %v956_v48  ;;  %v945_v4 = vadd.f32 %v944_v63, %v943_v45 }
 0x31c   : > { %1037 = vpush %v945_v4  ;;  %v959_v16 = vrot.slane %v958_v0, 1 }
 0x31e   : > { %v960_v34 = vadd.f32 %v959_v16, %v958_v0 }
 0x320   : > { %1039 = vpush %v960_v34 }
 0x34d   : > { %s1038_s23 = spop %1037 }
 0x34e   : > { %v947_v1 = vstv %s1038_s23 }
 0x351   : > { %s1040_s24 = spop %1039 }
 0x352   : > { %v962_v46 = vstv %s1040_s24 }
 0x353   : > { %v964_v7 = vmax.f32 %v962_v46, 1.0  ;;  %vm963_vm2 = vcmp.gt.f32.partialorder %v962_v46, 0.0 }
 0x355   : > { %1139 = vrcp.f32 %v964_v7 }
 0x35f   : > { %v1140_v5 = vpop.eup %1139 }
 0x360   : > { %v966_v3 = vmul.f32 %v1140_v5, %v947_v1 }
 0x362   : > { %v967_v6 = vsel %vm963_vm2, %v966_v3, 0.0 }
 0x363   : > { %969 = vst.msk [vmem:[#allocation7] sm:$0x1] %vm968_vm1, %v967_v6 }
 0x364 PF: > { %p1045_p10 = scmp.eq.s32.totalorder %s1241_s0, 1  ;;  %s1206_s25 = smov [#allocation7]  }
 0x365   : > { %s977_s26 = sshll.u32 %s1206_s25, 4  ;;  %s978_s26 = int_to_ptr.vmem [resolvable:$true] %s977_s26 }
 0x366   : > { %s1153_s27 = scalar_lea.vmem %s978_s26, 16  ;;  %s1159_s28 = scalar_lea.vmem %s978_s26, 32 }
 0x367   : > { %p1154_p11 = scmp.ne.s32.totalorder %s978_s26, %s1153_s27  ;;  %p1160_p0 = scmp.lt.s32.totalorder %s978_s26, %s978_s26 }
 0x368   : > { %p1161_p1 = scmp.lt.s32.totalorder %s1159_s28, %s1153_s27 }
 0x369   : > { %p1155_p12 = pnand %p1154_p11, %p1045_p10 }
 0x36a   : > { %p1162_p2 = por %p1161_p1, %p1160_p0 }
 0x36b   : > { %p1156_p13 = pneg %p1155_p12 }
 0x36d   : > { %p1163_p3 = pnand %p1162_p2, %p1156_p13 }
 0x36f   : > { %1166 = shalt.err (!%p1163_p3)
}
 0x370   : > { %s1167_s5 = scalar_lea.hbm %s1701_s4, 16 }
 0x371   : > { %p1168_p4 = scmp.ne.s32.totalorder %s1701_s4, %s1167_s5  ;;  %p1173_p7 = scmp.lt.u32.totalorder %s1167_s5, %s1701_s4 }
 0x373   : > { %p1169_p5 = pnand %p1168_p4, %p1045_p10 }
 0x375   : > { %p1170_p6 = pneg %p1169_p5 }
 0x377   : > { %p1175_p8 = pnand %p1173_p7, %p1170_p6 }
 0x379   : > { %1178 = shalt.err (!%p1175_p8)
}
 0x37a   : > { %1042 = dma.vmem_to_hbm [thread:$0]  (%p1045_p10), %s978_s26, 16, %s1701_s4, [#allocation8]  }
 0x37b   : > { %1186 = dma.done.wait (%p1045_p10), [#allocation8], 16  }
 0x37c   : > { %1188 = vsyncadd (%p1045_p10), [#allocation8], 4294967280 }
 0x37d PF: > { %s21_s20 = sadd.s32 1, %s1191_s20  }
 0x37e   : > { %p18_p9 = scmp.ge.s32.totalorder %s21_s20, 4  }
 0x380   :  { %20 = sbr.rel (!%p18_p9) target bundleno = 16 (0x10), region = 65 }
 0x387   :  { %990 = vsyncpa [#allocation8], 1 }
 0x388   :  { %992 = vsyncpa [#allocation8 + $0x1], 1 }

</bundles_post_ra>
